<compile_context>
chip_gen: v5e
topology: v5e:2x2
jax: 0.10.0
libtpu: 0.0.40
codegen_flags: <defaults>
</compile_context>

<pallas_src>
import jax
import jax.numpy as jnp
from jax.experimental import pallas as pl
from jax.experimental.pallas import tpu as pltpu


def _round_up(v, m):
    return ((v + m - 1) // m) * m


def resblock_kernel(x_ref, w_ref, b_ref, out_ref, xpad_ref, slab_ref):
    # x_ref   : (1, H, W, Cin)    unpadded input tile (channels pre-padded to 128)
    # w_ref   : (9*Cin, Cout)     3x3 weights with the 1x1 shortcut folded in
    # b_ref   : (1, Cout)         folded bias (f32)
    # out_ref : (1, H*W, Cout)    lane-dense output slab
    # xpad_ref: (H+2, W+2, Cin)   VMEM halo scratch (persists across grid steps)
    # slab_ref: (H*W, 9*Cin)      VMEM im2col scratch
    H = x_ref.shape[1]
    W = x_ref.shape[2]
    Cin = x_ref.shape[3]
    Cout = out_ref.shape[2]

    # Zero the halo border EVERY grid step.  The scratch persists across steps
    # and (with a "parallel" axis) across TensorCores, so this must not be
    # gated on pl.program_id.  Cost is ~(2H+2W)*Cin writes, negligible.
    zero_row = jnp.zeros((1, W + 2, Cin), dtype=xpad_ref.dtype)
    xpad_ref[0:1, :, :] = zero_row
    xpad_ref[H + 1:H + 2, :, :] = zero_row
    zero_col = jnp.zeros((H + 2, 1, Cin), dtype=xpad_ref.dtype)
    xpad_ref[:, 0:1, :] = zero_col
    xpad_ref[:, W + 1:W + 2, :] = zero_col

    # Build the padded image in VMEM (padding=1); the interior is fully
    # overwritten every step, so borders stay zero.  No HBM round trip.
    xpad_ref[1:H + 1, 1:W + 1, :] = x_ref[0]

    # im2col: pack the 9 shifted windows into one (H*W, 9*Cin) slab so the
    # 3x3 conv (+ folded 1x1 shortcut) becomes a single K=9*Cin MXU matmul.
    # Cin is a multiple of 128, so every tap write is lane-dense and aligned.
    for t in range(9):
        dy, dx = t // 3, t % 3
        patch = xpad_ref[dy:dy + H, dx:dx + W, :].reshape(H * W, Cin)
        slab_ref[:, t * Cin:(t + 1) * Cin] = patch

    # Single matmul with f32 accumulation; bias + ReLU epilogue in f32.
    y = jnp.dot(slab_ref[...], w_ref[...], preferred_element_type=jnp.float32)
    y = y + b_ref[...]            # (1, Cout) broadcasts over the H*W rows
    y = jnp.maximum(y, 0.0)       # ReLU
    out_ref[...] = y.reshape(1, H * W, Cout).astype(out_ref.dtype)


def resblock_forward(x_nhwc, w3, b3, ws, bs,
                     compute_dtype=jnp.bfloat16,
                     vmem_limit_bytes=48 * 1024 * 1024):
    """x_nhwc: (N, H, W, Cin); w3: (3,3,Cin,Cout) HWIO; b3: (Cout,);
    ws: (Cin, Cout); bs: (Cout,).  Returns (N, H, W, Cout) in x's dtype.

    compute_dtype: dtype for activations/weights inside the kernel (default
    bf16; accumulation is always f32).  Pass None to keep the input dtype.
    vmem_limit_bytes: raise toward ~96-112 MiB on v5e/v6e when strip-tiling;
    keep <= ~48-56 MiB on v7x (64 MiB physical VMEM)."""
    N, H, W, Cin = x_nhwc.shape
    Cout = w3.shape[-1]
    out_dtype = x_nhwc.dtype

    LANE = 128
    Cin_p = _round_up(Cin, LANE)
    Cout_p = _round_up(Cout, LANE)

    # Fold the 1x1 shortcut into the center tap of the 3x3 conv (linear ops,
    # exact in f32): conv3x3(x; w3) + conv1x1(x; ws) = conv3x3(x; w3') with
    # w3'[1,1] = w3[1,1] + ws, bias b3 + bs.
    w_folded = w3.astype(jnp.float32).at[1, 1].add(ws.astype(jnp.float32))
    b_folded = b3.astype(jnp.float32) + bs.astype(jnp.float32)

    # Pad channels to the 128-lane width (no-op when channels are already
    # lane-aligned, as at production sizes).  Padded rows/cols of the weights
    # are zero, padded output channels are sliced off below.
    w_folded = jnp.pad(w_folded,
                       ((0, 0), (0, 0), (0, Cin_p - Cin), (0, Cout_p - Cout)))
    b_folded = jnp.pad(b_folded, ((0, Cout_p - Cout),)).reshape(1, Cout_p)
    w_flat = w_folded.reshape(9 * Cin_p, Cout_p)   # matches im2col column order
    x_p = jnp.pad(x_nhwc, ((0, 0), (0, 0), (0, 0), (0, Cin_p - Cin)))

    if compute_dtype is not None:
        x_p = x_p.astype(compute_dtype)
        w_flat = w_flat.astype(compute_dtype)

    out = pl.pallas_call(
        resblock_kernel,
        out_shape=jax.ShapeDtypeStruct((N, H * W, Cout_p), out_dtype),
        grid_spec=pltpu.PrefetchScalarGridSpec(
            num_scalar_prefetch=0,
            grid=(N,),
            in_specs=[
                pl.BlockSpec((1, H, W, Cin_p), lambda n: (n, 0, 0, 0)),
                pl.BlockSpec((9 * Cin_p, Cout_p), lambda n: (0, 0)),
                pl.BlockSpec((1, Cout_p), lambda n: (0, 0)),
            ],
            out_specs=pl.BlockSpec((1, H * W, Cout_p), lambda n: (n, 0, 0)),
            scratch_shapes=[
                pltpu.VMEM((H + 2, W + 2, Cin_p), x_p.dtype),   # halo
                pltpu.VMEM((H * W, 9 * Cin_p), x_p.dtype),      # im2col slab
            ],
        ),
        compiler_params=pltpu.CompilerParams(
            dimension_semantics=("parallel",),
            vmem_limit_bytes=vmem_limit_bytes,
        ),
    )(x_p, w_flat, b_folded)

    # Strip channel padding and restore NHWC.
    return out[:, :, :Cout].reshape(N, H, W, Cout)


def resblock_reference(x_nhwc, w3, b3, ws, bs):
    """Plain-JAX reference (same math as the PyTorch module, un-folded)."""
    blocks = jax.lax.conv_general_dilated(
        x_nhwc, w3, window_strides=(1, 1), padding="SAME",
        dimension_numbers=("NHWC", "HWIO", "NHWC")) + b3
    shortcut = jnp.einsum("nhwc,co->nhwo", x_nhwc, ws) + bs
    return jnp.maximum(blocks + shortcut, 0.0)


if __name__ == "__main__":
    key = jax.random.PRNGKey(0)
    N, C, H, W = 2, 4, 16, 16  # PyTorch-style NCHW sizes

    k_x, k_w3, k_b3, k_ws, k_bs = jax.random.split(key, 5)
    x_nchw = jax.random.normal(k_x, (N, C, H, W), dtype=jnp.float32)
    # deterministic parameter init (synthetic, not a checkpoint)
    w3 = jax.random.normal(k_w3, (3, 3, C, C), dtype=jnp.float32) * 0.1
    b3 = jax.random.normal(k_b3, (C,), dtype=jnp.float32) * 0.1
    ws = jax.random.normal(k_ws, (C, C), dtype=jnp.float32) * 0.1
    bs = jax.random.normal(k_bs, (C,), dtype=jnp.float32) * 0.1

    # layout glue: convert NCHW -> NHWC for the TPU kernel
    x_nhwc = jnp.transpose(x_nchw, (0, 2, 3, 1))

    ref = jax.block_until_ready(resblock_reference(x_nhwc, w3, b3, ws, bs))

    # f32 path: tight tolerance (shortcut fold is exact in f32).
    out_f32 = jax.block_until_ready(
        resblock_forward(x_nhwc, w3, b3, ws, bs, compute_dtype=None))
    assert out_f32.shape == (N, H, W, C)
    assert jnp.allclose(out_f32, ref, atol=1e-4, rtol=1e-4), "f32 mismatch vs reference"

    # default bf16 compute path: looser tolerance for the bf16 cast.
    out_bf16 = jax.block_until_ready(resblock_forward(x_nhwc, w3, b3, ws, bs))
    assert out_bf16.shape == (N, H, W, C)
    assert jnp.allclose(out_bf16, ref, atol=5e-2, rtol=5e-2), "bf16 mismatch vs reference"

    print("KERNEL_OK")
</pallas_src>

<mosaic_0001>
module attributes {stable_mosaic.version = 11 : i64} {
  func.func @resblock_kernel(%arg0: i32, %arg1: memref<1x16x16x128xf32, #tpu.memory_space<vmem>>, %arg2: memref<1152x128xf32, #tpu.memory_space<vmem>>, %arg3: memref<1x128xf32, #tpu.memory_space<vmem>>, %arg4: memref<1x256x128xf32, #tpu.memory_space<vmem>>, %arg5: memref<18x18x128xf32, #tpu.memory_space<vmem>>, %arg6: memref<256x1152xf32, #tpu.memory_space<vmem>>) attributes {dimension_semantics = [#tpu.dimension_semantics<parallel>], iteration_bounds = array<i64: 2>, scalar_prefetch = 0 : i64, scratch_operands = 2 : i64, tpu.core_type = #tpu.core_type<tc>, window_params = [{transform_indices = @transform_0, window_bounds = array<i64: 1, 16, 16, 128>}, {pipeline_mode = #tpu.pipeline_mode<synchronous>, transform_indices = @transform_1, window_bounds = array<i64: 1152, 128>}, {pipeline_mode = #tpu.pipeline_mode<synchronous>, transform_indices = @transform_2, window_bounds = array<i64: 1, 128>}, {transform_indices = @transform_3, window_bounds = array<i64: 1, 256, 128>}]} {
    %cst = arith.constant 0.000000e+00 : f32
    %0 = vector.broadcast %cst : f32 to vector<1x18x128xf32>
    %c0 = arith.constant 0 : index
    %c0_0 = arith.constant 0 : index
    %c0_1 = arith.constant 0 : index
    %1 = vector.load %arg5[%c0, %c0_0, %c0_1] : memref<18x18x128xf32, #tpu.memory_space<vmem>>, vector<1x18x128xf32>
    tpu.vector_store %arg5[%c0, %c0_0, %c0_1], %0 {strides = array<i32>} : memref<18x18x128xf32, #tpu.memory_space<vmem>>, vector<1x18x128xf32>,
    %c17 = arith.constant 17 : index
    %c0_2 = arith.constant 0 : index
    %c0_3 = arith.constant 0 : index
    %2 = vector.load %arg5[%c17, %c0_2, %c0_3] : memref<18x18x128xf32, #tpu.memory_space<vmem>>, vector<1x18x128xf32>
    tpu.vector_store %arg5[%c17, %c0_2, %c0_3], %0 {strides = array<i32>} : memref<18x18x128xf32, #tpu.memory_space<vmem>>, vector<1x18x128xf32>,
    %cst_4 = arith.constant 0.000000e+00 : f32
    %3 = vector.broadcast %cst_4 : f32 to vector<18x1x128xf32>
    %c0_5 = arith.constant 0 : index
    %c0_6 = arith.constant 0 : index
    %c0_7 = arith.constant 0 : index
    %4 = vector.load %arg5[%c0_5, %c0_6, %c0_7] : memref<18x18x128xf32, #tpu.memory_space<vmem>>, vector<18x1x128xf32>
    tpu.vector_store %arg5[%c0_5, %c0_6, %c0_7], %3 {strides = array<i32>} : memref<18x18x128xf32, #tpu.memory_space<vmem>>, vector<18x1x128xf32>,
    %c0_8 = arith.constant 0 : index
    %c17_9 = arith.constant 17 : index
    %c0_10 = arith.constant 0 : index
    %5 = vector.load %arg5[%c0_8, %c17_9, %c0_10] : memref<18x18x128xf32, #tpu.memory_space<vmem>>, vector<18x1x128xf32>
    tpu.vector_store %arg5[%c0_8, %c17_9, %c0_10], %3 {strides = array<i32>} : memref<18x18x128xf32, #tpu.memory_space<vmem>>, vector<18x1x128xf32>,
    %c0_11 = arith.constant 0 : index
    %c0_12 = arith.constant 0 : index
    %c0_13 = arith.constant 0 : index
    %c0_14 = arith.constant 0 : index
    %6 = vector.load %arg1[%c0_11, %c0_12, %c0_13, %c0_14] : memref<1x16x16x128xf32, #tpu.memory_space<vmem>>, vector<1x16x16x128xf32>
    %7 = vector.shape_cast %6 : vector<1x16x16x128xf32> to vector<16x16x128xf32>
    %c1 = arith.constant 1 : index
    %c1_15 = arith.constant 1 : index
    %c0_16 = arith.constant 0 : index
    %8 = vector.load %arg5[%c1, %c1_15, %c0_16] : memref<18x18x128xf32, #tpu.memory_space<vmem>>, vector<16x16x128xf32>
    tpu.vector_store %arg5[%c1, %c1_15, %c0_16], %7 {strides = array<i32>} : memref<18x18x128xf32, #tpu.memory_space<vmem>>, vector<16x16x128xf32>,
    %c0_17 = arith.constant 0 : index
    %c0_18 = arith.constant 0 : index
    %c0_19 = arith.constant 0 : index
    %9 = vector.load %arg5[%c0_17, %c0_18, %c0_19] : memref<18x18x128xf32, #tpu.memory_space<vmem>>, vector<16x16x128xf32>
    %10 = vector.shape_cast %9 : vector<16x16x128xf32> to vector<256x128xf32>
    %c0_20 = arith.constant 0 : index
    %c0_21 = arith.constant 0 : index
    %11 = vector.load %arg6[%c0_20, %c0_21] : memref<256x1152xf32, #tpu.memory_space<vmem>>, vector<256x128xf32>
    tpu.vector_store %arg6[%c0_20, %c0_21], %10 {strides = array<i32>} : memref<256x1152xf32, #tpu.memory_space<vmem>>, vector<256x128xf32>,
    %c0_22 = arith.constant 0 : index
    %c1_23 = arith.constant 1 : index
    %c0_24 = arith.constant 0 : index
    %12 = vector.load %arg5[%c0_22, %c1_23, %c0_24] : memref<18x18x128xf32, #tpu.memory_space<vmem>>, vector<16x16x128xf32>
    %13 = vector.shape_cast %12 : vector<16x16x128xf32> to vector<256x128xf32>
    %c0_25 = arith.constant 0 : index
    %c128 = arith.constant 128 : index
    %14 = vector.load %arg6[%c0_25, %c128] : memref<256x1152xf32, #tpu.memory_space<vmem>>, vector<256x128xf32>
    tpu.vector_store %arg6[%c0_25, %c128], %13 {strides = array<i32>} : memref<256x1152xf32, #tpu.memory_space<vmem>>, vector<256x128xf32>,
    %c0_26 = arith.constant 0 : index
    %c2 = arith.constant 2 : index
    %c0_27 = arith.constant 0 : index
    %15 = vector.load %arg5[%c0_26, %c2, %c0_27] : memref<18x18x128xf32, #tpu.memory_space<vmem>>, vector<16x16x128xf32>
    %16 = vector.shape_cast %15 : vector<16x16x128xf32> to vector<256x128xf32>
    %c0_28 = arith.constant 0 : index
    %c256 = arith.constant 256 : index
    %17 = vector.load %arg6[%c0_28, %c256] : memref<256x1152xf32, #tpu.memory_space<vmem>>, vector<256x128xf32>
    tpu.vector_store %arg6[%c0_28, %c256], %16 {strides = array<i32>} : memref<256x1152xf32, #tpu.memory_space<vmem>>, vector<256x128xf32>,
    %c1_29 = arith.constant 1 : index
    %c0_30 = arith.constant 0 : index
    %c0_31 = arith.constant 0 : index
    %18 = vector.load %arg5[%c1_29, %c0_30, %c0_31] : memref<18x18x128xf32, #tpu.memory_space<vmem>>, vector<16x16x128xf32>
    %19 = vector.shape_cast %18 : vector<16x16x128xf32> to vector<256x128xf32>
    %c0_32 = arith.constant 0 : index
    %c384 = arith.constant 384 : index
    %20 = vector.load %arg6[%c0_32, %c384] : memref<256x1152xf32, #tpu.memory_space<vmem>>, vector<256x128xf32>
    tpu.vector_store %arg6[%c0_32, %c384], %19 {strides = array<i32>} : memref<256x1152xf32, #tpu.memory_space<vmem>>, vector<256x128xf32>,
    %c1_33 = arith.constant 1 : index
    %c1_34 = arith.constant 1 : index
    %c0_35 = arith.constant 0 : index
    %21 = vector.load %arg5[%c1_33, %c1_34, %c0_35] : memref<18x18x128xf32, #tpu.memory_space<vmem>>, vector<16x16x128xf32>
    %22 = vector.shape_cast %21 : vector<16x16x128xf32> to vector<256x128xf32>
    %c0_36 = arith.constant 0 : index
    %c512 = arith.constant 512 : index
    %23 = vector.load %arg6[%c0_36, %c512] : memref<256x1152xf32, #tpu.memory_space<vmem>>, vector<256x128xf32>
    tpu.vector_store %arg6[%c0_36, %c512], %22 {strides = array<i32>} : memref<256x1152xf32, #tpu.memory_space<vmem>>, vector<256x128xf32>,
    %c1_37 = arith.constant 1 : index
    %c2_38 = arith.constant 2 : index
    %c0_39 = arith.constant 0 : index
    %24 = vector.load %arg5[%c1_37, %c2_38, %c0_39] : memref<18x18x128xf32, #tpu.memory_space<vmem>>, vector<16x16x128xf32>
    %25 = vector.shape_cast %24 : vector<16x16x128xf32> to vector<256x128xf32>
    %c0_40 = arith.constant 0 : index
    %c640 = arith.constant 640 : index
    %26 = vector.load %arg6[%c0_40, %c640] : memref<256x1152xf32, #tpu.memory_space<vmem>>, vector<256x128xf32>
    tpu.vector_store %arg6[%c0_40, %c640], %25 {strides = array<i32>} : memref<256x1152xf32, #tpu.memory_space<vmem>>, vector<256x128xf32>,
    %c2_41 = arith.constant 2 : index
    %c0_42 = arith.constant 0 : index
    %c0_43 = arith.constant 0 : index
    %27 = vector.load %arg5[%c2_41, %c0_42, %c0_43] : memref<18x18x128xf32, #tpu.memory_space<vmem>>, vector<16x16x128xf32>
    %28 = vector.shape_cast %27 : vector<16x16x128xf32> to vector<256x128xf32>
    %c0_44 = arith.constant 0 : index
    %c768 = arith.constant 768 : index
    %29 = vector.load %arg6[%c0_44, %c768] : memref<256x1152xf32, #tpu.memory_space<vmem>>, vector<256x128xf32>
    tpu.vector_store %arg6[%c0_44, %c768], %28 {strides = array<i32>} : memref<256x1152xf32, #tpu.memory_space<vmem>>, vector<256x128xf32>,
    %c2_45 = arith.constant 2 : index
    %c1_46 = arith.constant 1 : index
    %c0_47 = arith.constant 0 : index
    %30 = vector.load %arg5[%c2_45, %c1_46, %c0_47] : memref<18x18x128xf32, #tpu.memory_space<vmem>>, vector<16x16x128xf32>
    %31 = vector.shape_cast %30 : vector<16x16x128xf32> to vector<256x128xf32>
    %c0_48 = arith.constant 0 : index
    %c896 = arith.constant 896 : index
    %32 = vector.load %arg6[%c0_48, %c896] : memref<256x1152xf32, #tpu.memory_space<vmem>>, vector<256x128xf32>
    tpu.vector_store %arg6[%c0_48, %c896], %31 {strides = array<i32>} : memref<256x1152xf32, #tpu.memory_space<vmem>>, vector<256x128xf32>,
    %c2_49 = arith.constant 2 : index
    %c2_50 = arith.constant 2 : index
    %c0_51 = arith.constant 0 : index
    %33 = vector.load %arg5[%c2_49, %c2_50, %c0_51] : memref<18x18x128xf32, #tpu.memory_space<vmem>>, vector<16x16x128xf32>
    %34 = vector.shape_cast %33 : vector<16x16x128xf32> to vector<256x128xf32>
    %c0_52 = arith.constant 0 : index
    %c1024 = arith.constant 1024 : index
    %35 = vector.load %arg6[%c0_52, %c1024] : memref<256x1152xf32, #tpu.memory_space<vmem>>, vector<256x128xf32>
    tpu.vector_store %arg6[%c0_52, %c1024], %34 {strides = array<i32>} : memref<256x1152xf32, #tpu.memory_space<vmem>>, vector<256x128xf32>,
    %c0_53 = arith.constant 0 : index
    %c0_54 = arith.constant 0 : index
    %36 = vector.load %arg6[%c0_53, %c0_54] : memref<256x1152xf32, #tpu.memory_space<vmem>>, vector<256x1152xf32>
    %c0_55 = arith.constant 0 : index
    %c0_56 = arith.constant 0 : index
    %37 = vector.load %arg2[%c0_55, %c0_56] : memref<1152x128xf32, #tpu.memory_space<vmem>>, vector<1152x128xf32>
    %cst_57 = arith.constant dense<0.000000e+00> : vector<256x128xf32>
    %38 = tpu.matmul %36, %37, %cst_57 {dimension_numbers = #tpu.dot_dimension_numbers<[1], [0], [0], [1], [0, 0, 1, 1], [], []>} : vector<256x1152xf32>, vector<1152x128xf32>, vector<256x128xf32> -> vector<256x128xf32>
    %c0_58 = arith.constant 0 : index
    %c0_59 = arith.constant 0 : index
    %39 = vector.load %arg3[%c0_58, %c0_59] : memref<1x128xf32, #tpu.memory_space<vmem>>, vector<1x128xf32>
    %40 = vector.broadcast %39 : vector<1x128xf32> to vector<256x128xf32>
    %41 = arith.addf %38, %40 : vector<256x128xf32>
    %cst_60 = arith.constant 0.000000e+00 : f32
    %42 = vector.broadcast %cst_60 : f32 to vector<256x128xf32>
    %43 = arith.maximumf %41, %42 : vector<256x128xf32>
    %44 = vector.shape_cast %43 : vector<256x128xf32> to vector<1x256x128xf32>
    %c0_61 = arith.constant 0 : index
    %c0_62 = arith.constant 0 : index
    %c0_63 = arith.constant 0 : index
    %45 = vector.load %arg4[%c0_61, %c0_62, %c0_63] : memref<1x256x128xf32, #tpu.memory_space<vmem>>, vector<1x256x128xf32>
    tpu.vector_store %arg4[%c0_61, %c0_62, %c0_63], %44 {strides = array<i32>} : memref<1x256x128xf32, #tpu.memory_space<vmem>>, vector<1x256x128xf32>,
    return
  }
  func.func @transform_0(%arg0: i32) -> (i32, i32, i32, i32) {
    %c0_i32 = arith.constant 0 : i32
    %c0_i32_0 = arith.constant 0 : i32
    %c0_i32_1 = arith.constant 0 : i32
    %c0_i32_2 = arith.constant 0 : i32
    return %arg0, %c0_i32, %c0_i32_0, %c0_i32_1 : i32, i32, i32, i32
  }
  func.func @transform_1(%arg0: i32) -> (i32, i32) {
    %c0_i32 = arith.constant 0 : i32
    %c0_i32_0 = arith.constant 0 : i32
    %c0_i32_1 = arith.constant 0 : i32
    return %c0_i32, %c0_i32_0 : i32, i32
  }
  func.func @transform_2(%arg0: i32) -> (i32, i32) {
    %c0_i32 = arith.constant 0 : i32
    %c0_i32_0 = arith.constant 0 : i32
    %c0_i32_1 = arith.constant 0 : i32
    return %c0_i32, %c0_i32_0 : i32, i32
  }
  func.func @transform_3(%arg0: i32) -> (i32, i32, i32) {
    %c0_i32 = arith.constant 0 : i32
    %c0_i32_0 = arith.constant 0 : i32
    %c0_i32_1 = arith.constant 0 : i32
    return %arg0, %c0_i32, %c0_i32_0 : i32, i32, i32
  }
}

</mosaic_0001>

<bundles_post_ra>
// kernel: tpu_custom_call.1
= control target key start
LH: loop header
LB: loop body
LE: loop exit
PB: predicated region body
PF: predicated region fallthrough
CT: control target
= control target key end

     0   :  { %8 = vsyncpa [#allocation5], 0  ;;  %s3555_s0 = inlined_call_operand.hbm [shape: f32[2,16,16,128], index: 0, kind: input, shape index: {}]   ;;  %s3556_s1 = inlined_call_operand.hbm [shape: f32[1152,128], index: 1, kind: input, shape index: {}]   ;;  %s3557_s2 = inlined_call_operand.vmem [shape: f32[1,128], index: 2, kind: input, shape index: {}]   ;;  %s3558_s3 = inlined_call_operand.hbm [shape: f32[2,256,128], index: 3, kind: output, shape index: {}]  }
   0x1   :  { %10 = vsyncpa [#allocation5 + $0x1], 0 }
   0x2   :  { %11 = vsyncpa [#allocation8], 0 }
   0x3   :  { %12 = vsyncpa [#allocation6], 0 }
   0x4   :  { %14 = vsyncpa [#allocation6 + $0x1], 0  ;;  %s2802_s12 = smov 0   ;;  %s2804_s13 = smov 0  }
   0x5   :  { %s2806_s14 = smov 0   ;;  %s2808_s15 = smov 0  }
   0x6 LB: > { %s2823_s16 = sadd.s32 4294967295, %s2774_s15   ;;  %s2509_s17 = sadd.s32 4294967294, %s2774_s15   ;;  %s2774_s15 = sphi %s2808_s15, %s3574_s15   ;;  %s2770_s14 = sphi %s2806_s14, %s3573_s14   ;;  %s2766_s13 = sphi %s2804_s13, %s3572_s13   ;;  %s2762_s12 = sphi %s2802_s12, %s3571_s12  }
   0x7   : > { %p40_p0 = scmp.ne.s32.totalorder %s2766_s13, %s2762_s12  ;;  %p41_p1 = scmp.eq.s32.totalorder %s2823_s16, 0 }
   0x8   : > { %p106_p2 = scmp.eq.s32.totalorder %s2823_s16, 1  ;;  %p112_p3 = scmp.eq.s32.totalorder %s2509_s17, 1 }
   0x9   : > { %p2832_p4 = por %p41_p1, %p40_p0  ;;  %p2510_p5 = scmp.ge.s32.totalorder %s2774_s15, 1 }
   0xa   : > { %p2837_p6 = por %p112_p3, %p40_p0  ;;  %p119_p7 = scmp.lt.s32.totalorder %s2774_s15, 3 }
   0xb   : > { %s130_s22 = sshll.u32 %s3556_s1, 4  ;;  %s2776_s24 = smov [#allocation7]   ;;  %s131_s22 = int_to_ptr.hbm [resolvable:$true] %s130_s22 }
   0xc   : > { %p2845_p8 = pnand %p2510_p5, %p119_p7  ;;  %s132_s25 = sshll.u32 %s2776_s24, 4  ;;  %s133_s25 = int_to_ptr.vmem [resolvable:$true] %s132_s25 }
   0xd   : > { %s2855_s26 = sadd.s32 1, %s2774_s15   ;;  %s2777_s27 = smov 128  }
   0xe   : > { %p2583_p9 = pneg %p2845_p8  ;;  %s2778_s28 = smov 8  }
   0xf   : > { %s24_s29 = ssub.s32 %s2774_s15, %s2855_s26  ;;  %s27_s30 = sadd.s32 1, %s2770_s14 }
  0x10   : > { %p2584_p10 = pnand %p2583_p9, %p41_p1  ;;  %p25_p12 = scmp.eq.s32.totalorder %s24_s29, 0 }
  0x11   : > { %p34_p13 = scmp.ne.s32.totalorder %s2770_s14, %s2766_s13  ;;  %p35_p0 = scmp.eq.s32.totalorder %s2774_s15, 0 }
  0x12   : > { %2586 = dma.hbm_to_vmem [thread:$0]  (!%p2584_p10), %s131_s22, 18432, %s133_s25, [#allocation8], %s2777_s27, %s2777_s27, %s2778_s28  }
  0x13   : > { %s2867_s4 = scalar_select %p25_p12, %s2770_s14, %s27_s30  }
  0x14   : > { %p2871_p3 = por %p106_p2, %p34_p13  ;;  %p2596_p5 = scmp.lt.s32.totalorder %s2774_s15, 2 }
  0x15   : > { %s149_s6 = sand.u32 1, %s2770_s14   ;;  %s2525_s7 = sshll.u32 %s2774_s15, 8 }
  0x16   : > { %p36_p7 = por %p35_p0, %p34_p13  ;;  %s2513_s8 = sshll.u32 %s149_s6, 8 }
  0x17   : > { %s158_s11 = scalar_lea.hbm %s3555_s0, %s2525_s7  ;;  %s153_s20 = scalar_lea.vmem [#allocation4], %s2513_s8 }
  0x18   : > { %s159_s17 = sshll.u32 %s158_s11, 4  ;;  %s161_s21 = sshll.u32 %s153_s20, 4  ;;  %s160_s17 = int_to_ptr.hbm [resolvable:$true] %s159_s17  ;;  %s162_s21 = int_to_ptr.vmem [resolvable:$true] %s161_s21 }
  0x19   : > { %p2881_p9 = pnand %p2596_p5, %p36_p7  ;;  %s150_s24 = scalar_lea.sflag [#allocation5], %s149_s6 }
  0x1a   : > { %s2674_s25 = sshra.s32 %s160_s17, 4  ;;  %s2681_s8 = scalar_lea.hbm %s3555_s0, 512  ;;  %s2675_s25 = int_to_ptr.hbm [resolvable:$true] %s2674_s25 }
  0x1b   : > { %s2676_s29 = scalar_lea.hbm %s2675_s25, 256  ;;  %p2678_p10 = pneg %p2881_p9 }
  0x1c   : > { %p2677_p2 = scmp.ne.s32.totalorder %s2675_s25, %s2676_s29  ;;  %p2682_p0 = scmp.lt.s32.totalorder %s2675_s25, %s3555_s0 }
  0x1d   : > { %p2683_p5 = scmp.lt.s32.totalorder %s2681_s8, %s2676_s29 }
  0x1e   : > { %p2679_p12 = pnand %p2678_p10, %p2677_p2 }
  0x1f   : > { %p2684_p7 = por %p2683_p5, %p2682_p0 }
  0x20   : > { %p2680_p13 = pneg %p2679_p12 }
  0x22   : > { %p2685_p11 = pnand %p2684_p7, %p2680_p13 }
  0x24   : > { %2688 = shalt.err (!%p2685_p11)
}
  0x25   : > { %2590 = dma.hbm_to_vmem [thread:$0]  (!%p2881_p9), %s160_s17, 4096, %s162_s21, %s150_s24, %s2777_s27, %s2777_s27, %s2778_s28  }
  0x26   : > { %173 = sbr.rel (%p2845_p8) target bundleno = 812 (0x32c), region = 32 }
  0x2b   : > { %s2901_s6 = sand.u32 1, %s2766_s13  }
  0x2c   : > { %s2517_s11 = sshll.u32 %s2901_s6, 8  ;;  %s176_s20 = scalar_lea.sflag [#allocation5], %s2901_s6 }
  0x2d   : > { %s2907_s25 = scalar_lea.vmem [#allocation4], %s2517_s11 }
  0x2e   : > { %2749 = dma.done.wait (%p2832_p4), %s176_s20, 4096  }
  0x2f   : > { %2751 = vsyncadd (%p2832_p4), %s176_s20, 4294963200 }
  0x30   : > { %2753 = dma.done.wait (%p41_p1), [#allocation8], 18432  }
  0x31   : > { %2755 = vsyncadd (%p41_p1), [#allocation8], 4294948864  ;;  %v2779_v0 = vmov 0.0   ;;  %v1196_v1 = vld [vmem:[#allocation7 + $0x78] sm:$0xff]  ;;  %v1195_v2 = vld [vmem:[#allocation7 + $0x70] sm:$0xff]  ;;  %s3442_s17 = scalar_lea.vmem [#allocation9], %s2517_s11 }
  0x32   : > { %219 = vst [vmem:[#allocation2 + $0x60] sm:$0x1] %v2779_v0  ;;  %2527 = vmatpush.msra.mxu1 %v1196_v1  ;;  %2528 = vmatpush.msra.mxu2 %v1196_v1  ;;  %v1194_v3 = vld [vmem:[#allocation7 + $0x68] sm:$0xff]  ;;  %v1193_v4 = vld [vmem:[#allocation7 + $0x60] sm:$0xff]  ;;  %v2929_v5 = vld [vmem:[%s2907_s25 + $0x30] sm:$0xff]  ;;  %s2526_s21 = sshll.u32 %s2823_s16, 8 }
  0x33   : > { %208 = vst [vmem:[#allocation2] sm:$0xff] %v2779_v0  ;;  %2529 = vmatpush.msra.mxu3 %v1196_v1  ;;  %1329 = vmatpush.msra.mxu0 %v1196_v1  ;;  %v1192_v6 = vld [vmem:[#allocation7 + $0x58] sm:$0xff]  ;;  %v1191_v7 = vld [vmem:[#allocation7 + $0x50] sm:$0xff]  ;;  %v1190_v8 = vld [vmem:[#allocation7 + $0x48] sm:$0xff]  ;;  %s2422_s29 = scalar_lea.hbm %s3558_s3, %s2526_s21  ;;  %s2423_s30 = sshll.u32 %s3442_s17, 4  ;;  %s2424_s30 = int_to_ptr.vmem [resolvable:$true] %s2423_s30 }
  0x34   : > { %209 = vst [vmem:[#allocation2 + $0x8] sm:$0xff] %v2779_v0  ;;  %2530 = vmatpush.msra.mxu1 %v1195_v2  ;;  %2531 = vmatpush.msra.mxu2 %v1195_v2  ;;  %v1189_v9 = vld [vmem:[#allocation7 + $0x40] sm:$0xff]  ;;  %v1188_v10 = vld [vmem:[#allocation7 + $0x38] sm:$0xff]  ;;  %v1187_v11 = vld [vmem:[#allocation7 + $0x30] sm:$0xff]  ;;  %s2425_s7 = sshll.u32 %s2422_s29, 4  ;;  %s2411_s8 = scalar_lea.sflag [#allocation6], %s2901_s6  ;;  %s2426_s7 = int_to_ptr.hbm [resolvable:$true] %s2425_s7 }
  0x35   : > { %210 = vst [vmem:[#allocation2 + $0x10] sm:$0x3] %v2779_v0  ;;  %2532 = vmatpush.msra.mxu3 %v1195_v2  ;;  %1330 = vmatpush.msra.mxu0 %v1195_v2  ;;  %v1186_v12 = vld [vmem:[#allocation7 + $0x28] sm:$0xff]  ;;  %v1185_v13 = vld [vmem:[#allocation7 + $0x20] sm:$0xff]  ;;  %v1184_v14 = vld [vmem:[#allocation7 + $0x18] sm:$0xff]  ;;  %s2718_s16 = sshra.s32 %s2426_s7, 4  ;;  %s2719_s16 = int_to_ptr.hbm [resolvable:$true] %s2718_s16 }
  0x36   : > { %212 = vst [vmem:[#allocation2 + $0x198] sm:$0xff] %v2779_v0  ;;  %2533 = vmatpush.msra.mxu1 %v1194_v3  ;;  %2534 = vmatpush.msra.mxu2 %v1194_v3  ;;  %v1183_v15 = vld [vmem:[#allocation7 + $0x10] sm:$0xff]  ;;  %v1182_v16 = vld [vmem:[#allocation7 + $0x8] sm:$0xff]  ;;  %v1181_v17 = vld [vmem:[#allocation7] sm:$0xff]  ;;  %s2720_s9 = scalar_lea.hbm %s2719_s16, 256  ;;  %s2724_s20 = scalar_lea.hbm %s3558_s3, 512 }
  0x37   : > { %213 = vst [vmem:[#allocation2 + $0x1a0] sm:$0xff] %v2779_v0  ;;  %2535 = vmatpush.msra.mxu3 %v1194_v3  ;;  %1331 = vmatpush.msra.mxu0 %v1194_v3  ;;  %v1228_v19 = vld [vmem:[#allocation7 + $0x178] sm:$0xff]  ;;  %v2960_v20 = vld [vmem:[%s2907_s25 + $0x70] sm:$0xff]  ;;  %v1226_v26 = vld [vmem:[#allocation7 + $0x168] sm:$0xff]  ;;  %p2721_p1 = scmp.ne.s32.totalorder %s2719_s16, %s2720_s9  ;;  %p2725_p11 = scmp.lt.s32.totalorder %s2719_s16, %s3558_s3 }
  0x38   : > { %214 = vst [vmem:[#allocation2 + $0x1a8] sm:$0x3] %v2779_v0  ;;  %2536 = vmatpush.msra.mxu1 %v1193_v4  ;;  %2537 = vmatpush.msra.mxu2 %v1193_v4  ;;  %v1212_v21 = vld [vmem:[#allocation7 + $0xf8] sm:$0xff]  ;;  %v1227_v23 = vld [vmem:[#allocation7 + $0x170] sm:$0xff]  ;;  %v1210_v28 = vld [vmem:[#allocation7 + $0xe8] sm:$0xff]  ;;  %p2726_p9 = scmp.lt.s32.totalorder %s2724_s20, %s2720_s9 }
  0x39   : > { %216 = vst [vmem:[#allocation2 + $0x18] sm:$0x1] %v2779_v0  ;;  %2538 = vmatpush.msra.mxu3 %v1193_v4  ;;  %1332 = vmatpush.msra.mxu0 %v1193_v4  ;;  %v1244_v22 = vld [vmem:[#allocation7 + $0x1f8] sm:$0xff]  ;;  %v1211_v24 = vld [vmem:[#allocation7 + $0xf0] sm:$0xff]  ;;  %v1242_v30 = vld [vmem:[#allocation7 + $0x1e8] sm:$0xff]  ;;  %p2722_p4 = pnand %p2721_p1, %p2871_p3 }
  0x3a   : > { %217 = vst [vmem:[#allocation2 + $0x30] sm:$0x1] %v2779_v0  ;;  %2539 = vmatpush.msra.mxu1 %v1192_v6  ;;  %2540 = vmatpush.msra.mxu2 %v1192_v6  ;;  %v1243_v25 = vld [vmem:[#allocation7 + $0x1f0] sm:$0xff]  ;;  %v1260_v27 = vld [vmem:[#allocation7 + $0x278] sm:$0xff]  ;;  %v1225_v31 = vld [vmem:[#allocation7 + $0x160] sm:$0xff]  ;;  %p2727_p2 = por %p2726_p9, %p2725_p11 }
  0x3b   : > { %218 = vst [vmem:[#allocation2 + $0x48] sm:$0x1] %v2779_v0  ;;  %2541 = vmatpush.msra.mxu3 %v1192_v6  ;;  %1333 = vmatpush.msra.mxu0 %v1192_v6  ;;  %v273_v29 = vld [vmem:[%s2907_s25 + $0xb0] sm:$0xff]  ;;  %v2971_v32 = vld [vmem:[%s2907_s25 + $0x38] sm:$0xff]  ;;  %v1209_v34 = vld [vmem:[#allocation7 + $0xe0] sm:$0xff]  ;;  %p2723_p8 = pneg %p2722_p4 }
  0x3c   : > { %220 = vst [vmem:[#allocation2 + $0x78] sm:$0x1] %v2779_v0  ;;  %2542 = vmatpush.msra.mxu1 %v1191_v7  ;;  %2543 = vmatpush.msra.mxu2 %v1191_v7  ;;  %v1259_v33 = vld [vmem:[#allocation7 + $0x270] sm:$0xff]  ;;  %v2975_v35 = vld [vmem:[%s2907_s25 + $0x78] sm:$0xff]  ;;  %v1241_v36 = vld [vmem:[#allocation7 + $0x1e0] sm:$0xff] }
  0x3d   : > { %221 = vst [vmem:[#allocation2 + $0x90] sm:$0x1] %v2779_v0  ;;  %2544 = vmatpush.msra.mxu3 %v1191_v7  ;;  %1334 = vmatpush.msra.mxu0 %v1191_v7  ;;  %v1224_v37 = vld [vmem:[#allocation7 + $0x158] sm:$0xff]  ;;  %v2979_v39 = vld [vmem:[%s2907_s25 + $0x40] sm:$0xff]  ;;  %v1258_v40 = vld [vmem:[#allocation7 + $0x268] sm:$0xff]  ;;  %p2728_p10 = pnand %p2727_p2, %p2723_p8 }
  0x3e   : > { %290 = vst [vmem:[#allocation2 + $0x61] sm:$0xff] %v2929_v5  ;;  %2545 = vmatpush.msra.mxu1 %v1190_v8  ;;  %2546 = vmatpush.msra.mxu2 %v1190_v8  ;;  %v274_v38 = vld [vmem:[%s2907_s25 + $0xb8] sm:$0xff]  ;;  %v2983_v41 = vld [vmem:[%s2907_s25 + $0x80] sm:$0xff]  ;;  %v1223_v46 = vld [vmem:[#allocation7 + $0x150] sm:$0xff] }
  0x3f   : > { %222 = vst [vmem:[#allocation2 + $0xa8] sm:$0x1] %v2779_v0  ;;  %2547 = vmatpush.msra.mxu3 %v1190_v8  ;;  %1335 = vmatpush.msra.mxu0 %v1190_v8  ;;  %v275_v42 = vld [vmem:[%s2907_s25 + $0xc0] sm:$0xff]  ;;  %v1240_v43 = vld [vmem:[#allocation7 + $0x1d8] sm:$0xff]  ;;  %v1239_v48 = vld [vmem:[#allocation7 + $0x1d0] sm:$0xff] }
  0x40   : > { %223 = vst [vmem:[#allocation2 + $0xc0] sm:$0x1] %v2779_v0  ;;  %2548 = vmatpush.msra.mxu1 %v1189_v9  ;;  %2549 = vmatpush.msra.mxu2 %v1189_v9  ;;  %v1208_v45 = vld [vmem:[#allocation7 + $0xd8] sm:$0xff]  ;;  %v1257_v49 = vld [vmem:[#allocation7 + $0x260] sm:$0xff]  ;;  %v2992_v50 = vld [vmem:[%s2907_s25 + $0x48] sm:$0xff] }
  0x41   : > { %224 = vst [vmem:[#allocation2 + $0xd8] sm:$0x1] %v2779_v0  ;;  %2550 = vmatpush.msra.mxu3 %v1189_v9  ;;  %1336 = vmatpush.msra.mxu0 %v1189_v9  ;;  %v1207_v51 = vld [vmem:[#allocation7 + $0xd0] sm:$0xff]  ;;  %v1222_v52 = vld [vmem:[#allocation7 + $0x148] sm:$0xff]  ;;  %v1256_v54 = vld [vmem:[#allocation7 + $0x258] sm:$0xff] }
  0x42   : > { %225 = vst [vmem:[#allocation2 + $0xf0] sm:$0x1] %v2779_v0  ;;  %2551 = vmatpush.msra.mxu1 %v1188_v10  ;;  %2552 = vmatpush.msra.mxu2 %v1188_v10  ;;  %v2996_v53 = vld [vmem:[%s2907_s25 + $0x88] sm:$0xff]  ;;  %v2999_v55 = vld [vmem:[%s2907_s25] sm:$0xff]  ;;  %v3007_v63 = vld [vmem:[%s2907_s25 + $0x50] sm:$0xff] }
  0x43   : > { %226 = vst [vmem:[#allocation2 + $0x108] sm:$0x1] %v2779_v0  ;;  %2553 = vmatpush.msra.mxu3 %v1188_v10  ;;  %1337 = vmatpush.msra.mxu0 %v1188_v10  ;;  %v276_v56 = vld [vmem:[%s2907_s25 + $0xc8] sm:$0xff]  ;;  %v1221_v60 = vld [vmem:[#allocation7 + $0x140] sm:$0xff]  ;;  %v3014_v2 = vld [vmem:[%s2907_s25 + $0x90] sm:$0xff] }
  0x44   : > { %227 = vst [vmem:[#allocation2 + $0x120] sm:$0x1] %v2779_v0  ;;  %2554 = vmatpush.msra.mxu1 %v1187_v11  ;;  %2555 = vmatpush.msra.mxu2 %v1187_v11  ;;  %v1238_v57 = vld [vmem:[#allocation7 + $0x1c8] sm:$0xff]  ;;  %v1237_v62 = vld [vmem:[#allocation7 + $0x1c0] sm:$0xff]  ;;  %v1255_v4 = vld [vmem:[#allocation7 + $0x250] sm:$0xff] }
  0x45   : > { %228 = vst [vmem:[#allocation2 + $0x138] sm:$0x1] %v2779_v0  ;;  %2556 = vmatpush.msra.mxu3 %v1187_v11  ;;  %1338 = vmatpush.msra.mxu0 %v1187_v11  ;;  %v2955_v18 = vld [vmem:[#allocation2 + $0x60] sm:$0xff]  ;;  %v1206_v59 = vld [vmem:[#allocation7 + $0xc8] sm:$0xff]  ;;  %v1205_v3 = vld [vmem:[#allocation7 + $0xc0] sm:$0xff] }
  0x46   : > { %229 = vst [vmem:[#allocation2 + $0x150] sm:$0x1] %v2779_v0  ;;  %2557 = vmatpush.msra.mxu1 %v1186_v12  ;;  %2558 = vmatpush.msra.mxu2 %v1186_v12  ;;  %v1220_v6 = vld [vmem:[#allocation7 + $0x138] sm:$0xff]  ;;  %v3017_v7 = vld [vmem:[%s2907_s25 + $0x8] sm:$0xff]  ;;  %v277_v8 = vld [vmem:[%s2907_s25 + $0xd0] sm:$0xff] }
  0x47   : > { %230 = vst [vmem:[#allocation2 + $0x168] sm:$0x1] %v2779_v0  ;;  %2559 = vmatpush.msra.mxu3 %v1186_v12  ;;  %1339 = vmatpush.msra.mxu0 %v1186_v12  ;;  %v1236_v9 = vld [vmem:[#allocation7 + $0x1b8] sm:$0xff]  ;;  %v1254_v11 = vld [vmem:[#allocation7 + $0x248] sm:$0xff]  ;;  %v1219_v12 = vld [vmem:[#allocation7 + $0x130] sm:$0xff] }
  0x48   : > { %231 = vst [vmem:[#allocation2 + $0x180] sm:$0x1] %v2779_v0  ;;  %2560 = vmatpush.msra.mxu1 %v1185_v13  ;;  %2561 = vmatpush.msra.mxu2 %v1185_v13  ;;  %v1204_v10 = vld [vmem:[#allocation7 + $0xb8] sm:$0xff] }
  0x49   : > { %234 = vst [vmem:[#allocation2 + $0x29] sm:$0x1] %v2779_v0  ;;  %2562 = vmatpush.msra.mxu3 %v1185_v13  ;;  %1340 = vmatpush.msra.mxu0 %v1185_v13  ;;  %v3025_v13 = vld [vmem:[%s2907_s25 + $0x58] sm:$0xff] }
  0x4a   : > { %235 = vst [vmem:[#allocation2 + $0x41] sm:$0x1] %v2779_v0  ;;  %2563 = vmatpush.msra.mxu1 %v1184_v14  ;;  %2564 = vmatpush.msra.mxu2 %v1184_v14 }
  0x4b   : > { %236 = vst [vmem:[#allocation2 + $0x59] sm:$0x1] %v2779_v0  ;;  %2565 = vmatpush.msra.mxu3 %v1184_v14  ;;  %1341 = vmatpush.msra.mxu0 %v1184_v14 }
  0x4c   : > { %237 = vst [vmem:[#allocation2 + $0x71] sm:$0x1] %v2779_v0  ;;  %2566 = vmatpush.msra.mxu1 %v1183_v15  ;;  %2567 = vmatpush.msra.mxu2 %v1183_v15 }
  0x4d   : > { %238 = vst [vmem:[#allocation2 + $0x89] sm:$0x1] %v2779_v0  ;;  %2568 = vmatpush.msra.mxu3 %v1183_v15  ;;  %1342 = vmatpush.msra.mxu0 %v1183_v15  ;;  %v3029_v15 = vld [vmem:[%s2907_s25 + $0x98] sm:$0xff] }
  0x4e   : > { %239 = vst [vmem:[#allocation2 + $0xa1] sm:$0x1] %v2779_v0  ;;  %2569 = vmatpush.msra.mxu1 %v1182_v16  ;;  %2570 = vmatpush.msra.mxu2 %v1182_v16 }
  0x4f   : > { %240 = vst [vmem:[#allocation2 + $0xb9] sm:$0x1] %v2779_v0  ;;  %2571 = vmatpush.msra.mxu3 %v1182_v16  ;;  %1343 = vmatpush.msra.mxu0 %v1182_v16  ;;  %v1203_v16 = vld [vmem:[#allocation7 + $0xb0] sm:$0xff] }
  0x50   : > { %241 = vst [vmem:[#allocation2 + $0xd1] sm:$0x1] %v2779_v0  ;;  %2572 = vmatpush.msra.mxu1 %v1181_v17  ;;  %2573 = vmatpush.msra.mxu2 %v1181_v17 }
  0x51   : > { %242 = vst [vmem:[#allocation2 + $0xe9] sm:$0x1] %v2779_v0  ;;  %1369 = vmatmul.f32.vlgmr.msra.gmra.mxu1 %v2955_v18  ;;  %2574 = vmatpush.msra.mxu3 %v1181_v17 }
  0x52   : > { %243 = vst [vmem:[#allocation2 + $0x101] sm:$0x1] %v2779_v0  ;;  %1555 = vmatpush.msrb.mxu2 %v1228_v19  ;;  %1442 = vmatpush.msrb.mxu1 %v1212_v21  ;;  %v3034_v19 = vld [vmem:[%s2907_s25 + $0x10] sm:$0xff]  ;;  %v1253_v21 = vld [vmem:[#allocation7 + $0x240] sm:$0xff] }
  0x53   : > { %244 = vst [vmem:[#allocation2 + $0x119] sm:$0x1] %v2779_v0  ;;  %1668 = vmatpush.msrb.mxu3 %v1244_v22  ;;  %1344 = vmatpush.msra.mxu0 %v1181_v17  ;;  %v1218_v22 = vld [vmem:[#allocation7 + $0x128] sm:$0xff] }
  0x54   : > { %245 = vst [vmem:[#allocation2 + $0x131] sm:$0x1] %v2779_v0  ;;  %1556 = vmatpush.msrb.mxu2 %v1227_v23  ;;  %1443 = vmatpush.msrb.mxu1 %v1211_v24  ;;  %v278_v23 = vld [vmem:[%s2907_s25 + $0xd8] sm:$0xff] }
  0x55   : > { %246 = vst [vmem:[#allocation2 + $0x149] sm:$0x1] %v2779_v0  ;;  %1669 = vmatpush.msrb.mxu3 %v1243_v25  ;;  %1781 = vmatpush.msrb.mxu0 %v1260_v27  ;;  %v1234_v25 = vld [vmem:[#allocation7 + $0x1a8] sm:$0xff] }
  0x56   : > { %247 = vst [vmem:[#allocation2 + $0x161] sm:$0x1] %v2779_v0  ;;  %1557 = vmatpush.msrb.mxu2 %v1226_v26  ;;  %1444 = vmatpush.msrb.mxu1 %v1210_v28  ;;  %v3042_v26 = vld [vmem:[%s2907_s25 + $0x60] sm:$0xff]  ;;  %v1202_v28 = vld [vmem:[#allocation7 + $0xa8] sm:$0xff] }
  0x57   : > { %248 = vst [vmem:[#allocation2 + $0x179] sm:$0x1] %v2779_v0  ;;  %1670 = vmatpush.msrb.mxu3 %v1242_v30  ;;  %1782 = vmatpush.msrb.mxu0 %v1259_v33  ;;  %v1252_v30 = vld [vmem:[#allocation7 + $0x238] sm:$0xff] }
  0x58   : > { %249 = vst [vmem:[#allocation2 + $0x191] sm:$0x1] %v2779_v0  ;;  %1558 = vmatpush.msrb.mxu2 %v1225_v31  ;;  %1445 = vmatpush.msrb.mxu1 %v1209_v34  ;;  %v1217_v31 = vld [vmem:[#allocation7 + $0x120] sm:$0xff]  ;;  %v3052_v33 = vld [vmem:[%s2907_s25 + $0x18] sm:$0xff] }
  0x59   : > { %298 = vst [vmem:[#allocation2 + $0xc1] sm:$0xff] %v2960_v20  ;;  %1671 = vmatpush.msrb.mxu3 %v1241_v36  ;;  %1783 = vmatpush.msrb.mxu0 %v1258_v40  ;;  %v1233_v34 = vld [vmem:[#allocation7 + $0x1a0] sm:$0xff]  ;;  %v1216_v40 = vld [vmem:[#allocation7 + $0x118] sm:$0xff] }
  0x5a   : > { %215 = vst [vmem:[#allocation2] sm:$0x1] %v2779_v0  ;;  %1559 = vmatpush.msrb.mxu2 %v1224_v37  ;;  %1446 = vmatpush.msrb.mxu1 %v1208_v45  ;;  %v1201_v36 = vld [vmem:[#allocation7 + $0xa0] sm:$0xff]  ;;  %v3064_v45 = vld [vmem:[%s2907_s25 + $0xa8] sm:$0xff] }
  0x5b   : > { %232 = vst [vmem:[#allocation2 + $0x198] sm:$0x1] %v2779_v0  ;;  %1672 = vmatpush.msrb.mxu3 %v1240_v43  ;;  %1784 = vmatpush.msrb.mxu0 %v1257_v49  ;;  %v279_v37 = vld [vmem:[%s2907_s25 + $0xe0] sm:$0xff]  ;;  %v3061_v43 = vld [vmem:[%s2907_s25 + $0x68] sm:$0xff] }
  0x5c   : > { %233 = vst [vmem:[#allocation2 + $0x11] sm:$0x1] %v2779_v0  ;;  %1560 = vmatpush.msrb.mxu2 %v1223_v46  ;;  %1447 = vmatpush.msrb.mxu1 %v1207_v51  ;;  %v1232_v51 = vld [vmem:[#allocation7 + $0x198] sm:$0xff] }
  0x5d   : > { %250 = vst [vmem:[#allocation2 + $0x1a9] sm:$0x1] %v2779_v0  ;;  %1673 = vmatpush.msrb.mxu3 %v1239_v48  ;;  %1785 = vmatpush.msrb.mxu0 %v1256_v54  ;;  %v280_v48 = vld [vmem:[%s2907_s25 + $0xe8] sm:$0xff] }
  0x5e   : > { %306 = vst [vmem:[#allocation2 + $0x121] sm:$0xff] %v273_v29  ;;  %1561 = vmatpush.msrb.mxu2 %v1222_v52  ;;  %1448 = vmatpush.msrb.mxu1 %v1206_v59  ;;  %v3049_v29 = vld [vmem:[%s2907_s25 + $0xa0] sm:$0xff]  ;;  %v1250_v52 = vld [vmem:[#allocation7 + $0x228] sm:$0xff] }
  0x5f   : > { %291 = vst [vmem:[#allocation2 + $0x69] sm:$0xff] %v2971_v32  ;;  %1674 = vmatpush.msrb.mxu3 %v1238_v57  ;;  %1786 = vmatpush.msrb.mxu0 %v1255_v4  ;;  %v1215_v57 = vld [vmem:[#allocation7 + $0x110] sm:$0xff]  ;;  %v1249_v59 = vld [vmem:[#allocation7 + $0x220] sm:$0xff] }
  0x60   : > { %v2986_v44 = vld [vmem:[#allocation2 + $0xc0] sm:$0xff]  ;;  %299 = vst [vmem:[#allocation2 + $0xc9] sm:$0xff] %v2975_v35  ;;  %1562 = vmatpush.msrb.mxu2 %v1221_v60  ;;  %1449 = vmatpush.msrb.mxu1 %v1205_v3 }
  0x61   : > { %1393 = vmatmul.f32.vlgmr.msra.gmra.mxu2 %v2986_v44  ;;  %v316_v47 = vld [vmem:[#allocation2] sm:$0xff]  ;;  %307 = vst [vmem:[#allocation2 + $0x129] sm:$0xff] %v274_v38  ;;  %1675 = vmatpush.msrb.mxu3 %v1237_v62  ;;  %v1214_v62 = vld [vmem:[#allocation7 + $0x108] sm:$0xff] }
  0x62   : > { %1345 = vmatmul.f32.vlgmr.msra.gmra.mxu0 %v316_v47  ;;  %292 = vst [vmem:[#allocation2 + $0x79] sm:$0xff] %v2979_v39  ;;  %1563 = vmatpush.msrb.mxu2 %v1220_v6  ;;  %v1251_v38 = vld [vmem:[#allocation7 + $0x230] sm:$0xff]  ;;  %v3070_v47 = vld [vmem:[%s2907_s25 + $0x20] sm:$0xff]  ;;  %v3085_v6 = vld [vmem:[%s2907_s25 + $0x28] sm:$0xff] }
  0x63   : > { %300 = vst [vmem:[#allocation2 + $0xd9] sm:$0xff] %v2983_v41  ;;  %1676 = vmatpush.msrb.mxu3 %v1236_v9  ;;  %1450 = vmatpush.msrb.mxu1 %v1204_v10  ;;  %v1199_v60 = vld [vmem:[#allocation7 + $0x90] sm:$0xff]  ;;  %v1230_v9 = vld [vmem:[#allocation7 + $0x188] sm:$0xff]  ;;  %v1248_v10 = vld [vmem:[#allocation7 + $0x218] sm:$0xff] }
  0x64   : > { %308 = vst [vmem:[#allocation2 + $0x139] sm:$0xff] %v275_v42  ;;  %1787 = vmatpush.msrb.mxu0 %v1254_v11  ;;  %1564 = vmatpush.msrb.mxu2 %v1219_v12  ;;  %v1198_v12 = vld [vmem:[#allocation7 + $0x88] sm:$0xff] }
  0x65   : > { %v340_v58 = vld [vmem:[#allocation2 + $0x120] sm:$0xff]  ;;  %293 = vst [vmem:[#allocation2 + $0x81] sm:$0xff] %v2992_v50  ;;  %1451 = vmatpush.msrb.mxu1 %v1203_v16  ;;  %v1229_v16 = vld [vmem:[#allocation7 + $0x180] sm:$0xff] }
  0x66   : > { %1417 = vmatmul.f32.vlgmr.msra.gmra.mxu3 %v340_v58  ;;  %v3003_v61 = vld [vmem:[#allocation2 + $0x68] sm:$0xff]  ;;  %301 = vst [vmem:[#allocation2 + $0xe1] sm:$0xff] %v2996_v53  ;;  %1788 = vmatpush.msrb.mxu0 %v1253_v21  ;;  %v1231_v58 = vld [vmem:[#allocation7 + $0x190] sm:$0xff]  ;;  %v1197_v21 = vld [vmem:[#allocation7 + $0x80] sm:$0xff] }
  0x67   : > { %1372 = vmatmul.f32.gmra.mxu1 %v3003_v61  ;;  %v3010_v1 = vld [vmem:[#allocation2 + $0xc8] sm:$0xff]  ;;  %284 = vst [vmem:[#allocation2 + $0x19] sm:$0xff] %v2999_v55  ;;  %1565 = vmatpush.msrb.mxu2 %v1218_v22 }
  0x68   : > { %309 = vst [vmem:[#allocation2 + $0x141] sm:$0xff] %v276_v56  ;;  %v341_v14 = vld [vmem:[#allocation2 + $0x128] sm:$0xff]  ;;  %1452 = vmatpush.msrb.mxu1 %v1202_v28  ;;  %1789 = vmatpush.msrb.mxu0 %v1252_v30  ;;  %v1246_v30 = vld [vmem:[#allocation7 + $0x208] sm:$0xff] }
  0x69   : > { %1396 = vmatmul.f32.gmra.mxu2 %v3010_v1  ;;  %294 = vst [vmem:[#allocation2 + $0x91] sm:$0xff] %v3007_v63  ;;  %v3031_v17 = vld [vmem:[#allocation2 + $0x78] sm:$0xff]  ;;  %v1200_v56 = vld [vmem:[#allocation7 + $0x98] sm:$0xff] }
  0x6a   : > { %1348 = vmatmul.f32.gmra.mxu0 %v2779_v0  ;;  %302 = vst [vmem:[#allocation2 + $0xf1] sm:$0xff] %v3014_v2  ;;  %v1235_v0 = vld [vmem:[#allocation7 + $0x1b0] sm:$0xff]  ;;  %v3038_v24 = vld [vmem:[#allocation2 + $0xd8] sm:$0xff]  ;;  %1566 = vmatpush.msrb.mxu2 %v1217_v31  ;;  %v1292_v22 = vld [vmem:[#allocation7 + $0x378] sm:$0xff] }
  0x6b   : > { %285 = vst [vmem:[#allocation2 + $0x21] sm:$0xff] %v3017_v7  ;;  %1677 = vmatpush.msrb.mxu3 %v1235_v0  ;;  %v342_v42 = vld [vmem:[#allocation2 + $0x138] sm:$0xff]  ;;  %1453 = vmatpush.msrb.mxu1 %v1201_v36  ;;  %v1247_v0 = vld [vmem:[#allocation7 + $0x210] sm:$0xff]  ;;  %v1308_v31 = vld [vmem:[#allocation7 + $0x3f8] sm:$0xff] }
  0x6c   : > { %310 = vst [vmem:[#allocation2 + $0x151] sm:$0xff] %v277_v8  ;;  %v3066_v46 = vld [vmem:[#allocation2 + $0x80] sm:$0xff]  ;;  %1790 = vmatpush.msrb.mxu0 %v1251_v38  ;;  %1567 = vmatpush.msrb.mxu2 %v1216_v40 }
  0x6d   : > { %295 = vst [vmem:[#allocation2 + $0x99] sm:$0xff] %v3025_v13  ;;  %1678 = vmatpush.msrb.mxu3 %v1234_v25  ;;  %v3073_v49 = vld [vmem:[#allocation2 + $0xe0] sm:$0xff]  ;;  %1454 = vmatpush.msrb.mxu1 %v1200_v56 }
  0x6e   : > { %1420 = vmatmul.f32.gmra.mxu3 %v341_v14  ;;  %303 = vst [vmem:[#allocation2 + $0xf9] sm:$0xff] %v3029_v15  ;;  %v3045_v27 = vld [vmem:[#allocation2 + $0x18] sm:$0xff]  ;;  %1791 = vmatpush.msrb.mxu0 %v1250_v52  ;;  %v1213_v14 = vld [vmem:[#allocation7 + $0x100] sm:$0xff]  ;;  %v1291_v52 = vld [vmem:[#allocation7 + $0x370] sm:$0xff] }
  0x6f   : > { %1375 = vmatmul.f32.gmra.mxu1 %v3031_v17  ;;  %286 = vst [vmem:[#allocation2 + $0x31] sm:$0xff] %v3034_v19  ;;  %1679 = vmatpush.msrb.mxu3 %v1233_v34  ;;  %v343_v3 = vld [vmem:[#allocation2 + $0x140] sm:$0xff]  ;;  %v1276_v34 = vld [vmem:[#allocation7 + $0x2f8] sm:$0xff] }
  0x70   : > { %311 = vst [vmem:[#allocation2 + $0x159] sm:$0xff] %v278_v23  ;;  %1568 = vmatpush.msrb.mxu2 %v1215_v57  ;;  %1792 = vmatpush.msrb.mxu0 %v1249_v59  ;;  %v3082_v4 = vld [vmem:[#allocation2 + $0x90] sm:$0xff]  ;;  %v1307_v59 = vld [vmem:[#allocation7 + $0x3f0] sm:$0xff] }
  0x71   : > { %1399 = vmatmul.f32.gmra.mxu2 %v3038_v24  ;;  %296 = vst [vmem:[#allocation2 + $0xa9] sm:$0xff] %v3042_v26  ;;  %1680 = vmatpush.msrb.mxu3 %v1232_v51  ;;  %v3087_v8 = vld [vmem:[#allocation2 + $0xf0] sm:$0xff] }
  0x72   : > { %1351 = vmatmul.f32.gmra.mxu0 %v3045_v27  ;;  %304 = vst [vmem:[#allocation2 + $0x109] sm:$0xff] %v3049_v29  ;;  %v3077_v54 = vld [vmem:[#allocation2 + $0x20] sm:$0xff]  ;;  %1455 = vmatpush.msrb.mxu1 %v1199_v60 }
  0x73   : > { %287 = vst [vmem:[#allocation2 + $0x39] sm:$0xff] %v3052_v33  ;;  %1681 = vmatpush.msrb.mxu3 %v1231_v58  ;;  %1569 = vmatpush.msrb.mxu2 %v1214_v62  ;;  %v344_v23 = vld [vmem:[#allocation2 + $0x150] sm:$0xff]  ;;  %v1275_v60 = vld [vmem:[#allocation7 + $0x2f0] sm:$0xff] }
  0x74   : > { %312 = vst [vmem:[#allocation2 + $0x169] sm:$0xff] %v279_v37  ;;  %1793 = vmatpush.msrb.mxu0 %v1248_v10  ;;  %1456 = vmatpush.msrb.mxu1 %v1198_v12  ;;  %v3095_v25 = vld [vmem:[#allocation2 + $0x98] sm:$0xff]  ;;  %v1245_v37 = vld [vmem:[#allocation7 + $0x200] sm:$0xff]  ;;  %v444_v10 = vld [vmem:[#allocation2 + $0x2] sm:$0xff] }
  0x75   : > { %297 = vst [vmem:[#allocation2 + $0xb1] sm:$0xff] %v3061_v43  ;;  %1682 = vmatpush.msrb.mxu3 %v1230_v9  ;;  %1570 = vmatpush.msrb.mxu2 %v1213_v14  ;;  %v3097_v28 = vld [vmem:[#allocation2 + $0xf8] sm:$0xff]  ;;  %v380_v9 = vld [vmem:[#allocation2 + $0x1] sm:$0xff] }
  0x76   : > { %1423 = vmatmul.f32.gmra.mxu3 %v342_v42  ;;  %305 = vst [vmem:[#allocation2 + $0x111] sm:$0xff] %v3064_v45  ;;  %v3091_v11 = vld [vmem:[#allocation2 + $0x30] sm:$0xff]  ;;  %1794 = vmatpush.msrb.mxu0 %v1247_v0  ;;  %v1323_v12 = vld [vmem:[#allocation7 + $0x470] sm:$0xff]  ;;  %v1290_v14 = vld [vmem:[#allocation7 + $0x368] sm:$0xff] }
  0x77   : > { %1378 = vmatmul.f32.gmra.mxu1 %v3066_v46  ;;  %288 = vst [vmem:[#allocation2 + $0x49] sm:$0xff] %v3070_v47  ;;  %1683 = vmatpush.msrb.mxu3 %v1229_v16  ;;  %v345_v38 = vld [vmem:[#allocation2 + $0x158] sm:$0xff]  ;;  %v381_v16 = vld [vmem:[#allocation2 + $0x9] sm:$0xff] }
  0x78   : > { %313 = vst [vmem:[#allocation2 + $0x171] sm:$0xff] %v280_v48  ;;  %1457 = vmatpush.msrb.mxu1 %v1197_v21  ;;  %2007 = vmatpush.msra.mxu2 %v1292_v22  ;;  %v3104_v40 = vld [vmem:[#allocation2 + $0xa8] sm:$0xff]  ;;  %v1306_v21 = vld [vmem:[#allocation7 + $0x3e8] sm:$0xff] }
  0x79   : > { %1402 = vmatmul.f32.gmra.mxu2 %v3073_v49  ;;  %289 = vst [vmem:[#allocation2 + $0x51] sm:$0xff] %v3085_v6  ;;  %1795 = vmatpush.msrb.mxu0 %v1246_v30  ;;  %v3106_v42 = vld [vmem:[#allocation2 + $0x108] sm:$0xff]  ;;  %v1274_v22 = vld [vmem:[#allocation7 + $0x2e8] sm:$0xff] }
  0x7a   : > { %1354 = vmatmul.f32.gmra.mxu0 %v3077_v54  ;;  %v3100_v36 = vld [vmem:[#allocation2 + $0x38] sm:$0xff]  ;;  %2120 = vmatpush.msra.mxu3 %v1308_v31  ;;  %v1324_v48 = vld [vmem:[#allocation7 + $0x478] sm:$0xff]  ;;  %v1289_v31 = vld [vmem:[#allocation7 + $0x360] sm:$0xff] }
  0x7b   : > { %1894 = vmatpush.msra.mxu1 %v1276_v34  ;;  %1796 = vmatpush.msrb.mxu0 %v1245_v37  ;;  %v346_v56 = vld [vmem:[#allocation2 + $0x168] sm:$0xff]  ;;  %v1322_v30 = vld [vmem:[#allocation7 + $0x468] sm:$0xff]  ;;  %v1305_v34 = vld [vmem:[#allocation7 + $0x3e0] sm:$0xff] }
  0x7c   : > { %2008 = vmatpush.msra.mxu2 %v1291_v52  ;;  %v3113_v57 = vld [vmem:[#allocation2 + $0xb0] sm:$0xff]  ;;  %2121 = vmatpush.msra.mxu3 %v1307_v59 }
  0x7d   : > { %2233 = vmatpush.msra.mxu0 %v1324_v48  ;;  %v3115_v58 = vld [vmem:[#allocation2 + $0x110] sm:$0xff]  ;;  %1895 = vmatpush.msra.mxu1 %v1275_v60  ;;  %v1272_v48 = vld [vmem:[#allocation7 + $0x2d8] sm:$0xff]  ;;  %v1319_v60 = vld [vmem:[#allocation7 + $0x450] sm:$0xff] }
  0x7e   : > { %1426 = vmatmul.f32.gmra.mxu3 %v343_v3  ;;  %v3109_v51 = vld [vmem:[#allocation2 + $0x48] sm:$0xff]  ;;  %2009 = vmatpush.msra.mxu2 %v1290_v14  ;;  %v1273_v37 = vld [vmem:[#allocation7 + $0x2e0] sm:$0xff] }
  0x7f   : > { %1381 = vmatmul.f32.gmra.mxu1 %v3082_v4  ;;  %v347_v3 = vld [vmem:[#allocation2 + $0x170] sm:$0xff]  ;;  %2234 = vmatpush.msra.mxu0 %v1323_v12 }
  0x80   : > { %v323_v62 = vld [vmem:[#allocation2 + $0x50] sm:$0xff]  ;;  %2122 = vmatpush.msra.mxu3 %v1306_v21  ;;  %1896 = vmatpush.msra.mxu1 %v1274_v22 }
  0x81   : > { %1405 = vmatmul.f32.gmra.mxu2 %v3087_v8  ;;  %v445_v0 = vld [vmem:[#allocation2 + $0xa] sm:$0xff]  ;;  %2235 = vmatpush.msra.mxu0 %v1322_v30  ;;  %v451_v52 = vld [vmem:[#allocation2 + $0x52] sm:$0xff] }
  0x82   : > { %1357 = vmatmul.f32.gmra.mxu0 %v3091_v11  ;;  %2010 = vmatpush.msra.mxu2 %v1289_v31  ;;  %v1285_v22 = vld [vmem:[#allocation7 + $0x340] sm:$0xff] }
  0x83   : > { %2123 = vmatpush.msra.mxu3 %v1305_v34  ;;  %1897 = vmatpush.msra.mxu1 %v1273_v37  ;;  %v1301_v31 = vld [vmem:[#allocation7 + $0x3c0] sm:$0xff] }
  0x85   : > { %1898 = vmatpush.msra.mxu1 %v1272_v48 }
  0x86   : > { %1429 = vmatmul.f32.gmra.mxu3 %v344_v23  ;;  %v446_v23 = vld [vmem:[#allocation2 + $0x1a] sm:$0xff] }
  0x87   : > { %1384 = vmatmul.f32.gmra.mxu1 %v3095_v25 }
  0x89   : > { %1408 = vmatmul.f32.gmra.mxu2 %v3097_v28 }
  0x8a   : > { %1360 = vmatmul.f32.gmra.mxu0 %v3100_v36 }
  0x8e   : > { %1432 = vmatmul.f32.gmra.mxu3 %v345_v38  ;;  %v1288_v38 = vld [vmem:[#allocation7 + $0x358] sm:$0xff] }
  0x8f   : > { %1387 = vmatmul.f32.gmra.mxu1 %v3104_v40  ;;  %2011 = vmatpush.msra.mxu2 %v1288_v38 }
  0x91   : > { %1411 = vmatmul.f32.gmra.mxu2 %v3106_v42 }
  0x92   : > { %1363 = vmatmul.f32.gmra.mxu0 %v3109_v51 }
  0x96   : > { %1435 = vmatmul.f32.gmra.mxu3 %v346_v56  ;;  %v1271_v56 = vld [vmem:[#allocation7 + $0x2d0] sm:$0xff] }
  0x97   : > { %1390 = vmatmul.f32.gmra.mxu1 %v3113_v57 }
  0x98   : > { %1899 = vmatpush.msra.mxu1 %v1271_v56  ;;  %v1316_v56 = vld [vmem:[#allocation7 + $0x438] sm:$0xff] }
  0x99   : > { %1414 = vmatmul.f32.gmra.mxu2 %v3115_v58 }
  0x9a   : > { %1366 = vmatmul.f32.gmra.mxu0 %v323_v62 }
  0x9e   : > { %1438 = vmatmul.f32.gmra.mxu3 %v347_v3 }
  0x9f   : > { %1458 = vmatmul.f32.vlgmr.msrb.gmra.mxu1 %v380_v9  ;;  %v453_v9 = vld [vmem:[#allocation2 + $0x6a] sm:$0xff] }
  0xa1   : > { %1571 = vmatmul.f32.vlgmr.msrb.gmra.mxu2 %v444_v10  ;;  %v1270_v10 = vld [vmem:[#allocation7 + $0x2c8] sm:$0xff] }
  0xa2   : > { %1797 = vmatmul.f32.vlgmr.msrb.gmra.mxu0 %v2999_v55  ;;  %1900 = vmatpush.msra.mxu1 %v1270_v10  ;;  %v1267_v10 = vld [vmem:[#allocation7 + $0x2b0] sm:$0xff] }
  0xa6   : > { %1684 = vmatmul.f32.vlgmr.msrb.gmra.mxu3 %v3045_v27  ;;  %v447_v27 = vld [vmem:[#allocation2 + $0x22] sm:$0xff] }
  0xa7   : > { %1461 = vmatmul.f32.gmra.mxu1 %v381_v16 }
  0xa9   : > { %1574 = vmatmul.f32.gmra.mxu2 %v445_v0  ;;  %v1318_v0 = vld [vmem:[#allocation7 + $0x448] sm:$0xff] }
  0xaa   : > { %1800 = vmatmul.f32.gmra.mxu0 %v3017_v7 }
  0xae   : > { %1687 = vmatmul.f32.gmra.mxu3 %v3077_v54  ;;  %v1321_v54 = vld [vmem:[#allocation7 + $0x460] sm:$0xff] }
  0xaf   : > { %1464 = vmatmul.f32.gmra.mxu1 %v2999_v55  ;;  %v448_v55 = vld [vmem:[#allocation2 + $0x32] sm:$0xff]  ;;  %2236 = vmatpush.msra.mxu0 %v1321_v54 }
  0xb0   : > { %v1317_v54 = vld [vmem:[#allocation7 + $0x440] sm:$0xff] }
  0xb1   : > { %1577 = vmatmul.f32.gmra.mxu2 %v446_v23 }
  0xb2   : > { %1803 = vmatmul.f32.gmra.mxu0 %v3034_v19 }
  0xb6   : > { %1690 = vmatmul.f32.gmra.mxu3 %v3091_v11  ;;  %v1304_v11 = vld [vmem:[#allocation7 + $0x3d8] sm:$0xff] }
  0xb7   : > { %1467 = vmatmul.f32.gmra.mxu1 %v3017_v7  ;;  %v449_v7 = vld [vmem:[#allocation2 + $0x3a] sm:$0xff]  ;;  %2124 = vmatpush.msra.mxu3 %v1304_v11 }
  0xb9   : > { %1580 = vmatmul.f32.gmra.mxu2 %v447_v27  ;;  %v1269_v27 = vld [vmem:[#allocation7 + $0x2c0] sm:$0xff] }
  0xba   : > { %1806 = vmatmul.f32.gmra.mxu0 %v3052_v33  ;;  %1901 = vmatpush.msra.mxu1 %v1269_v27 }
  0xbe   : > { %1693 = vmatmul.f32.gmra.mxu3 %v3100_v36  ;;  %v1320_v36 = vld [vmem:[#allocation7 + $0x458] sm:$0xff] }
  0xbf   : > { %1470 = vmatmul.f32.gmra.mxu1 %v3034_v19  ;;  %v450_v19 = vld [vmem:[#allocation2 + $0x4a] sm:$0xff]  ;;  %2237 = vmatpush.msra.mxu0 %v1320_v36 }
  0xc0   : > { %v1268_v36 = vld [vmem:[#allocation7 + $0x2b8] sm:$0xff] }
  0xc1   : > { %1583 = vmatmul.f32.gmra.mxu2 %v448_v55  ;;  %2238 = vmatpush.msra.mxu0 %v1319_v60 }
  0xc2   : > { %1809 = vmatmul.f32.gmra.mxu0 %v3070_v47  ;;  %1902 = vmatpush.msra.mxu1 %v1268_v36  ;;  %v461_v36 = vld [vmem:[#allocation2 + $0xca] sm:$0xff] }
  0xc3   : > { %2239 = vmatpush.msra.mxu0 %v1318_v0 }
  0xc4   : > { %1903 = vmatpush.msra.mxu1 %v1267_v10 }
  0xc5   : > { %2240 = vmatpush.msra.mxu0 %v1317_v54 }
  0xc6   : > { %1696 = vmatmul.f32.gmra.mxu3 %v3109_v51  ;;  %v1287_v51 = vld [vmem:[#allocation7 + $0x350] sm:$0xff] }
  0xc7   : > { %1473 = vmatmul.f32.gmra.mxu1 %v3052_v33  ;;  %2012 = vmatpush.msra.mxu2 %v1287_v51  ;;  %v1303_v33 = vld [vmem:[#allocation7 + $0x3d0] sm:$0xff] }
  0xc8   : > { %2125 = vmatpush.msra.mxu3 %v1303_v33  ;;  %2241 = vmatpush.msra.mxu0 %v1316_v56  ;;  %v1266_v56 = vld [vmem:[#allocation7 + $0x2a8] sm:$0xff] }
  0xc9   : > { %1586 = vmatmul.f32.gmra.mxu2 %v449_v7  ;;  %v1284_v7 = vld [vmem:[#allocation7 + $0x338] sm:$0xff]  ;;  %1904 = vmatpush.msra.mxu1 %v1266_v56  ;;  %v1265_v56 = vld [vmem:[#allocation7 + $0x2a0] sm:$0xff] }
  0xca   : > { %1812 = vmatmul.f32.gmra.mxu0 %v3085_v6 }
  0xcb   : > { %1905 = vmatpush.msra.mxu1 %v1265_v56 }
  0xce   : > { %1699 = vmatmul.f32.gmra.mxu3 %v323_v62  ;;  %v3138_v59 = vpop.f32.mrf.mxu1 }
  0xcf   : > { %1476 = vmatmul.f32.gmra.mxu1 %v3070_v47  ;;  %v452_v47 = vld [vmem:[#allocation2 + $0x62] sm:$0xff] }
  0xd1   : > { %1589 = vmatmul.f32.gmra.mxu2 %v450_v19  ;;  %v1300_v19 = vld [vmem:[#allocation7 + $0x3b8] sm:$0xff] }
  0xd2   : > { %1815 = vmatmul.f32.gmra.mxu0 %v2929_v5 }
  0xd6   : > { %1702 = vmatmul.f32.gmra.mxu3 %v2955_v18  ;;  %v1286_v18 = vld [vmem:[#allocation7 + $0x348] sm:$0xff] }
  0xd7   : > { %1479 = vmatmul.f32.gmra.mxu1 %v3085_v6  ;;  %2013 = vmatpush.msra.mxu2 %v1286_v18 }
  0xd9   : > { %1592 = vmatmul.f32.gmra.mxu2 %v451_v52 }
  0xda   : > { %1818 = vmatmul.f32.gmra.mxu0 %v2971_v32  ;;  %2014 = vmatpush.msra.mxu2 %v1285_v22  ;;  %v396_v22 = vld [vmem:[#allocation2 + $0xc1] sm:$0xff] }
  0xdc   : > { %2015 = vmatpush.msra.mxu2 %v1284_v7 }
  0xde   : > { %1705 = vmatmul.f32.gmra.mxu3 %v3003_v61  ;;  %v1302_v61 = vld [vmem:[#allocation7 + $0x3c8] sm:$0xff] }
  0xdf   : > { %1482 = vmatmul.f32.gmra.mxu1 %v2929_v5  ;;  %v3143_v62 = vpop.f32.mrf.mxu0  ;;  %2126 = vmatpush.msra.mxu3 %v1302_v61  ;;  %v1299_v61 = vld [vmem:[#allocation7 + $0x3b0] sm:$0xff] }
  0xe1   : > { %1595 = vmatmul.f32.gmra.mxu2 %v452_v47  ;;  %2127 = vmatpush.msra.mxu3 %v1301_v31 }
  0xe2   : > { %1821 = vmatmul.f32.gmra.mxu0 %v2979_v39 }
  0xe3   : > { %2128 = vmatpush.msra.mxu3 %v1300_v19 }
  0xe4   : > { %v3146_v6 = vpop.f32.mrf.mxu2  ;;  %v3148_v3 = vpop.f32.mrf.mxu1 }
  0xe5   : > { %2129 = vmatpush.msra.mxu3 %v1299_v61 }
  0xe6   : > { %1708 = vmatmul.f32.gmra.mxu3 %v3031_v17  ;;  %v454_v17 = vld [vmem:[#allocation2 + $0x7a] sm:$0xff] }
  0xe7   : > { %1485 = vmatmul.f32.gmra.mxu1 %v2971_v32  ;;  %v3152_v5 = vpop.f32.mrf.mxu0 }
  0xe9   : > { %v3154_v12 = vpop.f32.mrf.mxu3  ;;  %1598 = vmatmul.f32.gmra.mxu2 %v453_v9  ;;  %v1283_v9 = vld [vmem:[#allocation7 + $0x330] sm:$0xff] }
  0xea   : > { %1824 = vmatmul.f32.gmra.mxu0 %v2992_v50  ;;  %2016 = vmatpush.msra.mxu2 %v1283_v9 }
  0xec   : > { %v3157_v14 = vpop.f32.mrf.mxu2  ;;  %v3159_v16 = vpop.f32.mrf.mxu1 }
  0xee   : > { %1711 = vmatmul.f32.gmra.mxu3 %v3066_v46  ;;  %v455_v46 = vld [vmem:[#allocation2 + $0x82] sm:$0xff] }
  0xef   : > { %1488 = vmatmul.f32.gmra.mxu1 %v2979_v39  ;;  %v3163_v32 = vpop.f32.mrf.mxu0 }
  0xf1   : > { %v3165_v21 = vpop.f32.mrf.mxu3  ;;  %1601 = vmatmul.f32.gmra.mxu2 %v454_v17 }
  0xf2   : > { %1827 = vmatmul.f32.gmra.mxu0 %v3007_v63 }
  0xf4   : > { %v3168_v23 = vpop.f32.mrf.mxu2  ;;  %v3170_v30 = vpop.f32.mrf.mxu1 }
  0xf6   : > { %1714 = vmatmul.f32.gmra.mxu3 %v3082_v4  ;;  %v456_v4 = vld [vmem:[#allocation2 + $0x92] sm:$0xff] }
  0xf7   : > { %1491 = vmatmul.f32.gmra.mxu1 %v2992_v50  ;;  %v3174_v39 = vpop.f32.mrf.mxu0 }
  0xf9   : > { %v3176_v34 = vpop.f32.mrf.mxu3  ;;  %1604 = vmatmul.f32.gmra.mxu2 %v455_v46  ;;  %v1315_v46 = vld [vmem:[#allocation7 + $0x430] sm:$0xff] }
  0xfa   : > { %1830 = vmatmul.f32.gmra.mxu0 %v3025_v13 }
  0xfb   : > { %2242 = vmatpush.msra.mxu0 %v1315_v46  ;;  %v1314_v46 = vld [vmem:[#allocation7 + $0x428] sm:$0xff] }
  0xfc   : > { %v3179_v37 = vpop.f32.mrf.mxu2  ;;  %v3181_v55 = vpop.f32.mrf.mxu1 }
  0xfd   : > { %2243 = vmatpush.msra.mxu0 %v1314_v46 }
  0xfe   : > { %1717 = vmatmul.f32.gmra.mxu3 %v3095_v25  ;;  %v457_v25 = vld [vmem:[#allocation2 + $0x9a] sm:$0xff] }
  0xff   : > { %1494 = vmatmul.f32.gmra.mxu1 %v3007_v63  ;;  %v3185_v50 = vpop.f32.mrf.mxu0 }
 0x101   : > { %v3187_v38 = vpop.f32.mrf.mxu3  ;;  %1607 = vmatmul.f32.gmra.mxu2 %v456_v4 }
 0x102   : > { %1833 = vmatmul.f32.gmra.mxu0 %v3042_v26 }
 0x104   : > { %v3190_v11 = vpop.f32.mrf.mxu2  ;;  %v3192_v48 = vpop.f32.mrf.mxu1 }
 0x106   : > { %1720 = vmatmul.f32.gmra.mxu3 %v3104_v40  ;;  %v458_v40 = vld [vmem:[#allocation2 + $0xaa] sm:$0xff] }
 0x107   : > { %1497 = vmatmul.f32.gmra.mxu1 %v3025_v13  ;;  %v3196_v63 = vpop.f32.mrf.mxu0 }
 0x109   : > { %v3198_v51 = vpop.f32.mrf.mxu3  ;;  %1610 = vmatmul.f32.gmra.mxu2 %v457_v25  ;;  %v1282_v25 = vld [vmem:[#allocation7 + $0x328] sm:$0xff] }
 0x10a   : > { %1836 = vmatmul.f32.gmra.mxu0 %v3061_v43  ;;  %2017 = vmatpush.msra.mxu2 %v1282_v25 }
 0x10c   : > { %v3201_v52 = vpop.f32.mrf.mxu2  ;;  %v3203_v33 = vpop.f32.mrf.mxu1 }
 0x10e   : > { %1723 = vmatmul.f32.gmra.mxu3 %v3113_v57  ;;  %v459_v57 = vld [vmem:[#allocation2 + $0xb2] sm:$0xff] }
 0x10f   : > { %1500 = vmatmul.f32.gmra.mxu1 %v3042_v26  ;;  %v3207_v13 = vpop.f32.mrf.mxu0 }
 0x111   : > { %v3209_v47 = vpop.f32.mrf.mxu3  ;;  %1613 = vmatmul.f32.gmra.mxu2 %v458_v40  ;;  %v1298_v40 = vld [vmem:[#allocation7 + $0x3a8] sm:$0xff] }
 0x112   : > { %1839 = vmatmul.f32.gmra.mxu0 %v2960_v20  ;;  %2130 = vmatpush.msra.mxu3 %v1298_v40  ;;  %v1297_v40 = vld [vmem:[#allocation7 + $0x3a0] sm:$0xff] }
 0x114   : > { %v3212_v60 = vpop.f32.mrf.mxu2  ;;  %v3214_v18 = vpop.f32.mrf.mxu1  ;;  %2131 = vmatpush.msra.mxu3 %v1297_v40 }
 0x116   : > { %1726 = vmatmul.f32.gmra.mxu3 %v2986_v44  ;;  %v460_v44 = vld [vmem:[#allocation2 + $0xc2] sm:$0xff] }
 0x117   : > { %1503 = vmatmul.f32.gmra.mxu1 %v3061_v43  ;;  %v3218_v26 = vpop.f32.mrf.mxu0  ;;  %v3229_v43 = vld [vmem:[%s3557_s2] ss:$0 sm:$0xff] }
 0x118   : > { %v1347_v4 = vadd.f32 %v3229_v43, %v3143_v62  ;;  %v1350_v62 = vadd.f32 %v3229_v43, %v3152_v5  ;;  %v1353_v5 = vadd.f32 %v3229_v43, %v3163_v32 }
 0x119   : > { %v3220_v17 = vpop.f32.mrf.mxu3  ;;  %1616 = vmatmul.f32.gmra.mxu2 %v459_v57 }
 0x11a   : > { %1842 = vmatmul.f32.gmra.mxu0 %v2975_v35 }
 0x11c   : > { %v3223_v20 = vpop.f32.mrf.mxu2  ;;  %v1459_v0 = vpop.f32.mrf.mxu1 }
 0x11d   : > { %v1460_v54 = vadd.f32 %v1459_v0, %v1347_v4 }
 0x11e   : > { %1729 = vmatmul.f32.gmra.mxu3 %v3010_v1 }
 0x11f   : > { %1506 = vmatmul.f32.gmra.mxu1 %v396_v22  ;;  %v1798_v31 = vpop.f32.mrf.mxu0 }
 0x121   : > { %v3231_v27 = vpop.f32.mrf.mxu3  ;;  %1619 = vmatmul.f32.gmra.mxu2 %v460_v44 }
 0x122   : > { %1845 = vmatmul.f32.gmra.mxu0 %v2983_v41 }
 0x124   : > { %v1572_v1 = vpop.f32.mrf.mxu2  ;;  %v1462_v7 = vpop.f32.mrf.mxu1 }
 0x125   : > { %v1573_v19 = vadd.f32 %v1572_v1, %v1460_v54  ;;  %v1463_v10 = vadd.f32 %v1462_v7, %v1350_v62 }
 0x126   : > { %1732 = vmatmul.f32.gmra.mxu3 %v3038_v24 }
 0x127   : > { %1509 = vmatmul.f32.gmra.mxu1 %v2975_v35  ;;  %v1801_v9 = vpop.f32.mrf.mxu0  ;;  %v462_v35 = vld [vmem:[#allocation2 + $0xda] sm:$0xff] }
 0x129   : > { %v1685_v57 = vpop.f32.mrf.mxu3  ;;  %1622 = vmatmul.f32.gmra.mxu2 %v461_v36  ;;  %v463_v36 = vld [vmem:[#allocation2 + $0xe2] sm:$0xff] }
 0x12a   : > { %v1686_v61 = vadd.f32 %v1685_v57, %v1573_v19  ;;  %1848 = vmatmul.f32.gmra.mxu0 %v2996_v53  ;;  %v1281_v19 = vld [vmem:[#allocation7 + $0x320] sm:$0xff] }
 0x12b   : > { %2018 = vmatpush.msra.mxu2 %v1281_v19  ;;  %v1264_v19 = vld [vmem:[#allocation7 + $0x298] sm:$0xff] }
 0x12c   : > { %v3241_v0 = vadd.f32 %v1798_v31, %v1686_v61  ;;  %v1575_v24 = vpop.f32.mrf.mxu2  ;;  %v1465_v22 = vpop.f32.mrf.mxu1  ;;  %1906 = vmatpush.msra.mxu1 %v1264_v19 }
 0x12d   : > { %v1576_v44 = vadd.f32 %v1575_v24, %v1463_v10  ;;  %v1466_v31 = vadd.f32 %v1465_v22, %v1353_v5 }
 0x12e   : > { %1735 = vmatmul.f32.gmra.mxu3 %v3073_v49 }
 0x12f   : > { %1512 = vmatmul.f32.gmra.mxu1 %v2983_v41  ;;  %v1804_v4 = vpop.f32.mrf.mxu0 }
 0x131   : > { %v1688_v54 = vpop.f32.mrf.mxu3  ;;  %1625 = vmatmul.f32.gmra.mxu2 %v462_v35 }
 0x132   : > { %v1689_v1 = vadd.f32 %v1688_v54, %v1576_v44  ;;  %1851 = vmatmul.f32.gmra.mxu0 %v3014_v2  ;;  %v1313_v44 = vld [vmem:[#allocation7 + $0x420] sm:$0xff] }
 0x133   : > { %2244 = vmatpush.msra.mxu0 %v1313_v44 }
 0x134   : > { %v3248_v7 = vadd.f32 %v1801_v9, %v1689_v1  ;;  %v1578_v25 = vpop.f32.mrf.mxu2  ;;  %v1468_v49 = vpop.f32.mrf.mxu1  ;;  %v1356_v9 = vadd.f32 %v3229_v43, %v3174_v39  ;;  %v1359_v39 = vadd.f32 %v3229_v43, %v3185_v50 }
 0x135   : > { %v1579_v41 = vadd.f32 %v1578_v25, %v1466_v31  ;;  %v1280_v31 = vld [vmem:[#allocation7 + $0x318] sm:$0xff]  ;;  %v465_v25 = vld [vmem:[#allocation2 + $0xfa] sm:$0xff] }
 0x136   : > { %1738 = vmatmul.f32.gmra.mxu3 %v3087_v8  ;;  %v1469_v61 = vadd.f32 %v1468_v49, %v1356_v9  ;;  %2019 = vmatpush.msra.mxu2 %v1280_v31  ;;  %v1296_v49 = vld [vmem:[#allocation7 + $0x398] sm:$0xff] }
 0x137   : > { %1515 = vmatmul.f32.gmra.mxu1 %v2996_v53  ;;  %v1807_v57 = vpop.f32.mrf.mxu0  ;;  %v464_v53 = vld [vmem:[#allocation2 + $0xf2] sm:$0xff]  ;;  %2132 = vmatpush.msra.mxu3 %v1296_v49  ;;  %v595_v31 = vld [vmem:[#allocation2 + $0x129] sm:$0xff] }
 0x138   : > { %v531_v49 = vld [vmem:[#allocation2 + $0x128] sm:$0xff] }
 0x139   : > { %v1691_v32 = vpop.f32.mrf.mxu3  ;;  %1628 = vmatmul.f32.gmra.mxu2 %v463_v36  ;;  %v1362_v36 = vadd.f32 %v3229_v43, %v3196_v63  ;;  %v1365_v63 = vadd.f32 %v3229_v43, %v3207_v13 }
 0x13a   : > { %v1692_v62 = vadd.f32 %v1691_v32, %v1579_v41  ;;  %1854 = vmatmul.f32.gmra.mxu0 %v3029_v15 }
 0x13c   : > { %v3255_v10 = vadd.f32 %v1804_v4, %v1692_v62  ;;  %v1581_v8 = vpop.f32.mrf.mxu2  ;;  %v1471_v24 = vpop.f32.mrf.mxu1  ;;  %v1312_v62 = vld [vmem:[#allocation7 + $0x418] sm:$0xff] }
 0x13d   : > { %v1582_v22 = vadd.f32 %v1581_v8, %v1469_v61  ;;  %v1472_v4 = vadd.f32 %v1471_v24, %v1359_v39  ;;  %v594_v8 = vld [vmem:[#allocation2 + $0x121] sm:$0xff]  ;;  %2245 = vmatpush.msra.mxu0 %v1312_v62  ;;  %v532_v62 = vld [vmem:[#allocation2 + $0x138] sm:$0xff] }
 0x13e   : > { %1741 = vmatmul.f32.gmra.mxu3 %v3097_v28  ;;  %v1279_v39 = vld [vmem:[#allocation7 + $0x310] sm:$0xff] }
 0x13f   : > { %1518 = vmatmul.f32.gmra.mxu1 %v3014_v2  ;;  %v1810_v35 = vpop.f32.mrf.mxu0  ;;  %2020 = vmatpush.msra.mxu2 %v1279_v39 }
 0x141   : > { %v1694_v46 = vpop.f32.mrf.mxu3  ;;  %1631 = vmatmul.f32.gmra.mxu2 %v464_v53  ;;  %v530_v53 = vld [vmem:[#allocation2 + $0x120] sm:$0xff] }
 0x142   : > { %v1695_v54 = vadd.f32 %v1694_v46, %v1582_v22  ;;  %1857 = vmatmul.f32.gmra.mxu0 %v3049_v29 }
 0x144   : > { %v3262_v5 = vadd.f32 %v1807_v57, %v1695_v54  ;;  %v1584_v1 = vpop.f32.mrf.mxu2  ;;  %v1474_v28 = vpop.f32.mrf.mxu1  ;;  %v467_v54 = vld [vmem:[#allocation2 + $0x112] sm:$0xff] }
 0x145   : > { %v1585_v2 = vadd.f32 %v1584_v1, %v1472_v4  ;;  %v1475_v56 = vadd.f32 %v1474_v28, %v1362_v36  ;;  %v1295_v4 = vld [vmem:[#allocation7 + $0x390] sm:$0xff] }
 0x146   : > { %1744 = vmatmul.f32.gmra.mxu3 %v3106_v42  ;;  %v1263_v1 = vld [vmem:[#allocation7 + $0x290] sm:$0xff] }
 0x147   : > { %1521 = vmatmul.f32.gmra.mxu1 %v3029_v15  ;;  %v1813_v41 = vpop.f32.mrf.mxu0  ;;  %v466_v15 = vld [vmem:[#allocation2 + $0x10a] sm:$0xff]  ;;  %2133 = vmatpush.msra.mxu3 %v1295_v4 }
 0x148   : > { %1907 = vmatpush.msra.mxu1 %v1263_v1  ;;  %v533_v1 = vld [vmem:[#allocation2 + $0x140] sm:$0xff] }
 0x149   : > { %v1697_v50 = vpop.f32.mrf.mxu3  ;;  %1634 = vmatmul.f32.gmra.mxu2 %v465_v25 }
 0x14a   : > { %v1698_v40 = vadd.f32 %v1697_v50, %v1585_v2  ;;  %1860 = vmatmul.f32.gmra.mxu0 %v3064_v45  ;;  %v1368_v2 = vadd.f32 %v3229_v43, %v3218_v26  ;;  %v1371_v26 = vadd.f32 %v3229_v43, %v3138_v59  ;;  %v3288_v59 = vld [vmem:[#allocation2 + $0x141] sm:$0xff] }
 0x14c   : > { %v3269_v57 = vadd.f32 %v1810_v35, %v1698_v40  ;;  %v1587_v42 = vpop.f32.mrf.mxu2  ;;  %v1477_v32 = vpop.f32.mrf.mxu1 }
 0x14d   : > { %v1588_v9 = vadd.f32 %v1587_v42, %v1475_v56  ;;  %v1478_v44 = vadd.f32 %v1477_v32, %v1365_v63  ;;  %v1311_v56 = vld [vmem:[#allocation7 + $0x410] sm:$0xff] }
 0x14e   : > { %1747 = vmatmul.f32.gmra.mxu3 %v3115_v58  ;;  %v596_v32 = vld [vmem:[#allocation2 + $0x139] sm:$0xff]  ;;  %2246 = vmatpush.msra.mxu0 %v1311_v56 }
 0x14f   : > { %1524 = vmatmul.f32.gmra.mxu1 %v3049_v29  ;;  %v1816_v61 = vpop.f32.mrf.mxu0 }
 0x151   : > { %v1700_v24 = vpop.f32.mrf.mxu3  ;;  %1637 = vmatmul.f32.gmra.mxu2 %v466_v15 }
 0x152   : > { %v1701_v22 = vadd.f32 %v1700_v24, %v1588_v9  ;;  %1863 = vmatmul.f32.gmra.mxu0 %v594_v8 }
 0x154   : > { %v3275_v35 = vadd.f32 %v1813_v41, %v1701_v22  ;;  %v1590_v58 = vpop.f32.mrf.mxu2  ;;  %v1480_v46 = vpop.f32.mrf.mxu1 }
 0x155   : > { %v1591_v29 = vadd.f32 %v1590_v58, %v1478_v44  ;;  %v1481_v19 = vadd.f32 %v1480_v46, %v1368_v2  ;;  %v3286_v44 = vld [vmem:[#allocation2 + $0x12a] sm:$0xff]  ;;  %v1294_v58 = vld [vmem:[#allocation7 + $0x388] sm:$0xff] }
 0x156   : > { %1750 = vmatmul.f32.gmra.mxu3 %v530_v53  ;;  %v1278_v53 = vld [vmem:[#allocation7 + $0x308] sm:$0xff] }
 0x157   : > { %1527 = vmatmul.f32.gmra.mxu1 %v3064_v45  ;;  %v1819_v28 = vpop.f32.mrf.mxu0  ;;  %v468_v45 = vld [vmem:[#allocation2 + $0x122] sm:$0xff]  ;;  %2021 = vmatpush.msra.mxu2 %v1278_v53  ;;  %v1262_v46 = vld [vmem:[#allocation7 + $0x288] sm:$0xff]  ;;  %v1293_v53 = vld [vmem:[#allocation7 + $0x380] sm:$0xff] }
 0x158   : > { %2134 = vmatpush.msra.mxu3 %v1294_v58  ;;  %1908 = vmatpush.msra.mxu1 %v1262_v46  ;;  %v3317_v58 = vld [vmem:[#allocation2 + $0x159] sm:$0xff] }
 0x159   : > { %v1703_v13 = vpop.f32.mrf.mxu3  ;;  %1640 = vmatmul.f32.gmra.mxu2 %v467_v54  ;;  %v1374_v54 = vadd.f32 %v3229_v43, %v3148_v3 }
 0x15a   : > { %v1704_v25 = vadd.f32 %v1703_v13, %v1591_v29  ;;  %1866 = vmatmul.f32.gmra.mxu0 %v595_v31  ;;  %2135 = vmatpush.msra.mxu3 %v1293_v53  ;;  %v3336_v53 = vld [vmem:[#allocation2 + $0x15a] sm:$0xff] }
 0x15c   : > { %v3280_v41 = vadd.f32 %v1816_v61, %v1704_v25  ;;  %v1593_v50 = vpop.f32.mrf.mxu2  ;;  %v1483_v36 = vpop.f32.mrf.mxu1  ;;  %v3297_v25 = vld [vmem:[%s2907_s25 + $0xf0] sm:$0xff] }
 0x15d   : > { %v1594_v40 = vadd.f32 %v1593_v50, %v1481_v19  ;;  %v1484_v61 = vadd.f32 %v1483_v36, %v1371_v26  ;;  %v3299_v19 = vld [vmem:[#allocation2 + $0x13a] sm:$0xff]  ;;  %314 = vst [vmem:[#allocation2 + $0x181] sm:$0xff] %v3297_v25  ;;  %v3302_v36 = vld [vmem:[#allocation2 + $0x151] sm:$0xff] }
 0x15e   : > { %1753 = vmatmul.f32.gmra.mxu3 %v531_v49  ;;  %v1310_v50 = vld [vmem:[#allocation7 + $0x408] sm:$0xff] }
 0x15f   : > { %1530 = vmatmul.f32.gmra.mxu1 %v594_v8  ;;  %v1822_v42 = vpop.f32.mrf.mxu0  ;;  %2247 = vmatpush.msra.mxu0 %v1310_v50  ;;  %v1309_v50 = vld [vmem:[#allocation7 + $0x400] sm:$0xff] }
 0x161   : > { %v1706_v9 = vpop.f32.mrf.mxu3  ;;  %1643 = vmatmul.f32.gmra.mxu2 %v468_v45  ;;  %v1377_v45 = vadd.f32 %v3229_v43, %v3159_v16  ;;  %2248 = vmatpush.msra.mxu0 %v1309_v50  ;;  %v3347_v50 = vld [vmem:[#allocation2 + $0x16a] sm:$0xff] }
 0x162   : > { %v1707_v15 = vadd.f32 %v1706_v9, %v1594_v40  ;;  %1869 = vmatmul.f32.gmra.mxu0 %v596_v32 }
 0x164   : > { %v3284_v24 = vadd.f32 %v1819_v28, %v1707_v15  ;;  %v1596_v63 = vpop.f32.mrf.mxu2  ;;  %v1486_v22 = vpop.f32.mrf.mxu1 }
 0x165   : > { %v1597_v8 = vadd.f32 %v1596_v63, %v1484_v61  ;;  %v1487_v28 = vadd.f32 %v1486_v22, %v1374_v54  ;;  %v3311_v61 = vld [vmem:[%s2907_s25 + $0xf8] sm:$0xff]  ;;  %v535_v54 = vld [vmem:[#allocation2 + $0x158] sm:$0xff] }
 0x166   : > { %1756 = vmatmul.f32.gmra.mxu3 %v532_v62  ;;  %v1277_v62 = vld [vmem:[#allocation7 + $0x300] sm:$0xff]  ;;  %v3313_v22 = vld [vmem:[#allocation2 + $0x142] sm:$0xff]  ;;  %315 = vst [vmem:[#allocation2 + $0x189] sm:$0xff] %v3311_v61 }
 0x167   : > { %1533 = vmatmul.f32.gmra.mxu1 %v595_v31  ;;  %v1825_v39 = vpop.f32.mrf.mxu0  ;;  %2022 = vmatpush.msra.mxu2 %v1277_v62 }
 0x169   : > { %v1709_v29 = vpop.f32.mrf.mxu3  ;;  %1646 = vmatmul.f32.gmra.mxu2 %v3286_v44 }
 0x16a   : > { %v1710_v4 = vadd.f32 %v1709_v29, %v1597_v8  ;;  %1872 = vmatmul.f32.gmra.mxu0 %v3288_v59  ;;  %v1261_v8 = vld [vmem:[#allocation7 + $0x280] sm:$0xff] }
 0x16b   : > { %1909 = vmatpush.msra.mxu1 %v1261_v8 }
 0x16c   : > { %v3294_v13 = vadd.f32 %v1822_v42, %v1710_v4  ;;  %v1599_v2 = vpop.f32.mrf.mxu2  ;;  %v1489_v31 = vpop.f32.mrf.mxu1  ;;  %v534_v42 = vld [vmem:[#allocation2 + $0x150] sm:$0xff] }
 0x16d   : > { %v1600_v49 = vadd.f32 %v1599_v2, %v1487_v28  ;;  %v1490_v9 = vadd.f32 %v1489_v31, %v1377_v45  ;;  %v3328_v45 = vld [vmem:[#allocation2 + $0x169] sm:$0xff] }
 0x16e   : > { %1759 = vmatmul.f32.gmra.mxu3 %v533_v1 }
 0x16f   : > { %1536 = vmatmul.f32.gmra.mxu1 %v596_v32  ;;  %v1828_v3 = vpop.f32.mrf.mxu0 }
 0x171   : > { %v1712_v40 = vpop.f32.mrf.mxu3  ;;  %1649 = vmatmul.f32.gmra.mxu2 %v3299_v19 }
 0x172   : > { %v1713_v56 = vadd.f32 %v1712_v40, %v1600_v49  ;;  %1875 = vmatmul.f32.gmra.mxu0 %v3302_v36  ;;  %v3325_v49 = vld [vmem:[#allocation2 + $0x152] sm:$0xff] }
 0x174   : > { %v3308_v26 = vadd.f32 %v1825_v39, %v1713_v56  ;;  %v1602_v15 = vpop.f32.mrf.mxu2  ;;  %v1492_v32 = vpop.f32.mrf.mxu1  ;;  %v1380_v39 = vadd.f32 %v3229_v43, %v3170_v30 }
 0x175   : > { %v1603_v63 = vadd.f32 %v1602_v15, %v1490_v9 }
 0x176   : > { %1762 = vmatmul.f32.gmra.mxu3 %v534_v42  ;;  %v1493_v4 = vadd.f32 %v1492_v32, %v1380_v39  ;;  %v536_v42 = vld [vmem:[#allocation2 + $0x168] sm:$0xff] }
 0x177   : > { %1539 = vmatmul.f32.gmra.mxu1 %v3288_v59  ;;  %v1831_v16 = vpop.f32.mrf.mxu0 }
 0x179   : > { %v1715_v46 = vpop.f32.mrf.mxu3  ;;  %1652 = vmatmul.f32.gmra.mxu2 %v3313_v22 }
 0x17a   : > { %v1716_v29 = vadd.f32 %v1715_v46, %v1603_v63  ;;  %1878 = vmatmul.f32.gmra.mxu0 %v3317_v58  ;;  %v3339_v46 = vld [vmem:[#allocation2 + $0x171] sm:$0xff] }
 0x17c   : > { %v3323_v1 = vadd.f32 %v1828_v3, %v1716_v29  ;;  %v1605_v28 = vpop.f32.mrf.mxu2  ;;  %v1495_v2 = vpop.f32.mrf.mxu1  ;;  %v1383_v3 = vadd.f32 %v3229_v43, %v3181_v55  ;;  %v1386_v55 = vadd.f32 %v3229_v43, %v3192_v48  ;;  %v1389_v48 = vadd.f32 %v3229_v43, %v3203_v33 }
 0x17d   : > { %v1606_v31 = vadd.f32 %v1605_v28, %v1493_v4  ;;  %v1392_v33 = vadd.f32 %v3229_v43, %v3214_v18  ;;  %v1395_v18 = vadd.f32 %v3229_v43, %v3146_v6  ;;  %v1398_v6 = vadd.f32 %v3229_v43, %v3157_v14 }
 0x17e   : > { %1765 = vmatmul.f32.gmra.mxu3 %v535_v54  ;;  %v1496_v9 = vadd.f32 %v1495_v2, %v1383_v3 }
 0x17f   : > { %1542 = vmatmul.f32.gmra.mxu1 %v3302_v36  ;;  %v1834_v40 = vpop.f32.mrf.mxu0 }
 0x181   : > { %v1718_v30 = vpop.f32.mrf.mxu3  ;;  %1655 = vmatmul.f32.gmra.mxu2 %v3325_v49 }
 0x182   : > { %v1719_v56 = vadd.f32 %v1718_v30, %v1606_v31  ;;  %1881 = vmatmul.f32.gmra.mxu0 %v3328_v45 }
 0x184   : > { %v3334_v15 = vadd.f32 %v1831_v16, %v1719_v56  ;;  %v1608_v32 = vpop.f32.mrf.mxu2  ;;  %v1498_v62 = vpop.f32.mrf.mxu1  ;;  %v537_v16 = vld [vmem:[#allocation2 + $0x170] sm:$0xff] }
 0x185   : > { %v1609_v63 = vadd.f32 %v1608_v32, %v1496_v9  ;;  %v1499_v54 = vadd.f32 %v1498_v62, %v1386_v55 }
 0x186   : > { %1768 = vmatmul.f32.gmra.mxu3 %v536_v42 }
 0x187   : > { %1545 = vmatmul.f32.gmra.mxu1 %v3317_v58  ;;  %v1837_v8 = vpop.f32.mrf.mxu0 }
 0x189   : > { %v1721_v39 = vpop.f32.mrf.mxu3  ;;  %1658 = vmatmul.f32.gmra.mxu2 %v3336_v53 }
 0x18a   : > { %v1722_v29 = vadd.f32 %v1721_v39, %v1609_v63  ;;  %1884 = vmatmul.f32.gmra.mxu0 %v3339_v46  ;;  %v3359_v39 = vld [vmem:[#allocation2 + $0x172] sm:$0xff] }
 0x18c   : > { %v3345_v4 = vadd.f32 %v1834_v40, %v1722_v29  ;;  %v1611_v28 = vpop.f32.mrf.mxu2  ;;  %v1501_v2 = vpop.f32.mrf.mxu1  ;;  %v3354_v40 = vld [vmem:[#allocation2 + $0x180] sm:$0xff] }
 0x18d   : > { %v1612_v31 = vadd.f32 %v1611_v28, %v1499_v54  ;;  %v1502_v42 = vadd.f32 %v1501_v2, %v1389_v48  ;;  %v701_v48 = vld [vmem:[#allocation2 + $0x30] sm:$0xff] }
 0x18e   : > { %1771 = vmatmul.f32.gmra.mxu3 %v537_v16 }
 0x18f   : > { %1548 = vmatmul.f32.gmra.mxu1 %v3328_v45  ;;  %v1840_v30 = vpop.f32.mrf.mxu0 }
 0x191   : > { %v1724_v3 = vpop.f32.mrf.mxu3  ;;  %1661 = vmatmul.f32.gmra.mxu2 %v3347_v50 }
 0x192   : > { %v1725_v56 = vadd.f32 %v1724_v3, %v1612_v31  ;;  %1887 = vmatmul.f32.gmra.mxu0 %v3297_v25  ;;  %v636_v31 = vld [vmem:[#allocation2 + $0x1a] sm:$0xff] }
 0x194   : > { %v3356_v9 = vadd.f32 %v1837_v8, %v1725_v56  ;;  %v1614_v32 = vpop.f32.mrf.mxu2  ;;  %v1504_v62 = vpop.f32.mrf.mxu1  ;;  %v3366_v8 = vld [vmem:[#allocation2 + $0x188] sm:$0xff] }
 0x195   : > { %v1615_v63 = vadd.f32 %v1614_v32, %v1502_v42  ;;  %v1505_v16 = vadd.f32 %v1504_v62, %v1392_v33  ;;  %v829_v42 = vld [vmem:[#allocation2 + $0x32] sm:$0xff] }
 0x196   : > { %3564 = vst [vmem:[#allocation13_spill] sm:$0xff] %v3356_v9  ;;  %1774 = vmatmul.f32.gmra.mxu3 %v3354_v40 }
 0x197   : > { %1551 = vmatmul.f32.gmra.mxu1 %v3339_v46  ;;  %v1843_v55 = vpop.f32.mrf.mxu0 }
 0x199   : > { %v1727_v29 = vpop.f32.mrf.mxu3  ;;  %1664 = vmatmul.f32.gmra.mxu2 %v3359_v39 }
 0x19a   : > { %v1728_v25 = vadd.f32 %v1727_v29, %v1615_v63  ;;  %1890 = vmatmul.f32.gmra.mxu0 %v3311_v61 }
 0x19c   : > { %v3368_v54 = vadd.f32 %v1840_v30, %v1728_v25  ;;  %v1617_v28 = vpop.f32.mrf.mxu2  ;;  %v1507_v2 = vpop.f32.mrf.mxu1  ;;  %v765_v30 = vld [vmem:[#allocation2 + $0x31] sm:$0xff]  ;;  %v637_v25 = vld [vmem:[#allocation2 + $0x22] sm:$0xff] }
 0x19d   : > { %v1618_v3 = vadd.f32 %v1617_v28, %v1505_v16  ;;  %v1508_v62 = vadd.f32 %v1507_v2, %v1395_v18  ;;  %v702_v16 = vld [vmem:[#allocation2 + $0x38] sm:$0xff] }
 0x19e   : > { %3565 = vst [vmem:[#allocation14_spill] sm:$0xff] %v3368_v54  ;;  %1777 = vmatmul.f32.gmra.mxu3 %v3366_v8 }
 0x19f   : > { %1910 = vmatmul.f32.vlgmr.msra.gmra.mxu1 %v636_v31  ;;  %v1846_v56 = vpop.f32.mrf.mxu0  ;;  %v830_v31 = vld [vmem:[#allocation2 + $0x3a] sm:$0xff] }
 0x1a1   : > { %v1730_v32 = vpop.f32.mrf.mxu3  ;;  %2023 = vmatmul.f32.vlgmr.msra.gmra.mxu2 %v701_v48  ;;  %v766_v48 = vld [vmem:[#allocation2 + $0x39] sm:$0xff] }
 0x1a2   : > { %v1731_v61 = vadd.f32 %v1730_v32, %v1618_v3  ;;  %2249 = vmatmul.f32.vlgmr.msra.gmra.mxu0 %v829_v42 }
 0x1a4   : > { %v3373_v63 = vadd.f32 %v1843_v55, %v1731_v61  ;;  %v1620_v29 = vpop.f32.mrf.mxu2  ;;  %v1510_v33 = vpop.f32.mrf.mxu1 }
 0x1a5   : > { %v1621_v54 = vadd.f32 %v1620_v29, %v1508_v62  ;;  %v1511_v2 = vadd.f32 %v1510_v33, %v1398_v6  ;;  %v703_v62 = vld [vmem:[#allocation2 + $0x48] sm:$0xff] }
 0x1a6   : > { %2136 = vmatmul.f32.vlgmr.msra.gmra.mxu3 %v765_v30  ;;  %v831_v29 = vld [vmem:[#allocation2 + $0x4a] sm:$0xff] }
 0x1a7   : > { %1913 = vmatmul.f32.gmra.mxu1 %v637_v25  ;;  %v1849_v28 = vpop.f32.mrf.mxu0  ;;  %v1401_v25 = vadd.f32 %v3229_v43, %v3168_v23 }
 0x1a9   : > { %v1733_v9 = vpop.f32.mrf.mxu3  ;;  %2026 = vmatmul.f32.gmra.mxu2 %v702_v16 }
 0x1aa   : > { %v1734_v3 = vadd.f32 %v1733_v9, %v1621_v54  ;;  %2252 = vmatmul.f32.gmra.mxu0 %v830_v31  ;;  %v767_v54 = vld [vmem:[#allocation2 + $0x49] sm:$0xff] }
 0x1ac   : > { %v3377_v55 = vadd.f32 %v1846_v56, %v1734_v3  ;;  %v1623_v18 = vpop.f32.mrf.mxu2  ;;  %v1513_v32 = vpop.f32.mrf.mxu1 }
 0x1ad   : > { %v1624_v61 = vadd.f32 %v1623_v18, %v1511_v2  ;;  %v1514_v9 = vadd.f32 %v1513_v32, %v1401_v25  ;;  %v704_v2 = vld [vmem:[#allocation2 + $0x50] sm:$0xff]  ;;  %v1404_v18 = vadd.f32 %v3229_v43, %v3179_v37 }
 0x1ae   : > { %2139 = vmatmul.f32.gmra.mxu3 %v766_v48  ;;  %v832_v48 = vld [vmem:[#allocation2 + $0x52] sm:$0xff] }
 0x1af   : > { %1916 = vmatmul.f32.gmra.mxu1 %v829_v42  ;;  %v1852_v30 = vpop.f32.mrf.mxu0  ;;  %v768_v32 = vld [vmem:[#allocation2 + $0x51] sm:$0xff] }
 0x1b1   : > { %v1736_v14 = vpop.f32.mrf.mxu3  ;;  %2029 = vmatmul.f32.gmra.mxu2 %v703_v62 }
 0x1b2   : > { %v1737_v16 = vadd.f32 %v1736_v14, %v1624_v61  ;;  %2255 = vmatmul.f32.gmra.mxu0 %v831_v29 }
 0x1b4   : > { %v3381_v33 = vadd.f32 %v1849_v28, %v1737_v16  ;;  %v1626_v56 = vpop.f32.mrf.mxu2  ;;  %v1516_v6 = vpop.f32.mrf.mxu1 }
 0x1b5   : > { %v1627_v3 = vadd.f32 %v1626_v56, %v1514_v9  ;;  %v1517_v61 = vadd.f32 %v1516_v6, %v1404_v18  ;;  %v705_v9 = vld [vmem:[#allocation2 + $0x60] sm:$0xff]  ;;  %v1407_v56 = vadd.f32 %v3229_v43, %v3190_v11 }
 0x1b6   : > { %2142 = vmatmul.f32.gmra.mxu3 %v767_v54  ;;  %v833_v54 = vld [vmem:[#allocation2 + $0x62] sm:$0xff] }
 0x1b7   : > { %1919 = vmatmul.f32.gmra.mxu1 %v830_v31  ;;  %v1855_v42 = vpop.f32.mrf.mxu0  ;;  %v769_v6 = vld [vmem:[#allocation2 + $0x61] sm:$0xff] }
 0x1b9   : > { %v1739_v23 = vpop.f32.mrf.mxu3  ;;  %2032 = vmatmul.f32.gmra.mxu2 %v704_v2 }
 0x1ba   : > { %v1740_v62 = vadd.f32 %v1739_v23, %v1627_v3  ;;  %2258 = vmatmul.f32.gmra.mxu0 %v832_v48 }
 0x1bc   : > { %v3385_v25 = vadd.f32 %v1852_v30, %v1740_v62  ;;  %v1629_v28 = vpop.f32.mrf.mxu2  ;;  %v1519_v14 = vpop.f32.mrf.mxu1 }
 0x1bd   : > { %v1630_v16 = vadd.f32 %v1629_v28, %v1517_v61  ;;  %v1520_v3 = vadd.f32 %v1519_v14, %v1407_v56  ;;  %v706_v61 = vld [vmem:[#allocation2 + $0x68] sm:$0xff]  ;;  %v1410_v28 = vadd.f32 %v3229_v43, %v3201_v52 }
 0x1be   : > { %2145 = vmatmul.f32.gmra.mxu3 %v768_v32  ;;  %v834_v32 = vld [vmem:[#allocation2 + $0x6a] sm:$0xff] }
 0x1bf   : > { %1922 = vmatmul.f32.gmra.mxu1 %v831_v29  ;;  %v1858_v31 = vpop.f32.mrf.mxu0  ;;  %v770_v14 = vld [vmem:[#allocation2 + $0x69] sm:$0xff] }
 0x1c1   : > { %v1742_v37 = vpop.f32.mrf.mxu3  ;;  %2035 = vmatmul.f32.gmra.mxu2 %v705_v9 }
 0x1c2   : > { %v1743_v2 = vadd.f32 %v1742_v37, %v1630_v16  ;;  %2261 = vmatmul.f32.gmra.mxu0 %v833_v54 }
 0x1c4   : > { %v3389_v18 = vadd.f32 %v1855_v42, %v1743_v2  ;;  %v1632_v30 = vpop.f32.mrf.mxu2  ;;  %v1522_v23 = vpop.f32.mrf.mxu1 }
 0x1c5   : > { %v1633_v62 = vadd.f32 %v1632_v30, %v1520_v3  ;;  %v1523_v16 = vadd.f32 %v1522_v23, %v1410_v28  ;;  %v707_v3 = vld [vmem:[#allocation2 + $0x78] sm:$0xff]  ;;  %v1413_v30 = vadd.f32 %v3229_v43, %v3212_v60 }
 0x1c6   : > { %2148 = vmatmul.f32.gmra.mxu3 %v769_v6  ;;  %v835_v6 = vld [vmem:[#allocation2 + $0x7a] sm:$0xff] }
 0x1c7   : > { %1925 = vmatmul.f32.gmra.mxu1 %v832_v48  ;;  %v1861_v29 = vpop.f32.mrf.mxu0  ;;  %v771_v23 = vld [vmem:[#allocation2 + $0x79] sm:$0xff] }
 0x1c9   : > { %v1745_v11 = vpop.f32.mrf.mxu3  ;;  %2038 = vmatmul.f32.gmra.mxu2 %v706_v61 }
 0x1ca   : > { %v1746_v9 = vadd.f32 %v1745_v11, %v1633_v62  ;;  %2264 = vmatmul.f32.gmra.mxu0 %v834_v32 }
 0x1cc   : > { %v3393_v56 = vadd.f32 %v1858_v31, %v1746_v9  ;;  %v1635_v42 = vpop.f32.mrf.mxu2  ;;  %v1525_v37 = vpop.f32.mrf.mxu1 }
 0x1cd   : > { %v1636_v2 = vadd.f32 %v1635_v42, %v1523_v16  ;;  %v1526_v62 = vadd.f32 %v1525_v37, %v1413_v30  ;;  %v708_v16 = vld [vmem:[#allocation2 + $0x80] sm:$0xff]  ;;  %v1416_v42 = vadd.f32 %v3229_v43, %v3223_v20 }
 0x1ce   : > { %2151 = vmatmul.f32.gmra.mxu3 %v770_v14  ;;  %v836_v14 = vld [vmem:[#allocation2 + $0x82] sm:$0xff] }
 0x1cf   : > { %1928 = vmatmul.f32.gmra.mxu1 %v833_v54  ;;  %v1864_v48 = vpop.f32.mrf.mxu0  ;;  %v772_v37 = vld [vmem:[#allocation2 + $0x81] sm:$0xff] }
 0x1d1   : > { %v1748_v52 = vpop.f32.mrf.mxu3  ;;  %2041 = vmatmul.f32.gmra.mxu2 %v707_v3 }
 0x1d2   : > { %v1749_v61 = vadd.f32 %v1748_v52, %v1636_v2  ;;  %2267 = vmatmul.f32.gmra.mxu0 %v835_v6 }
 0x1d4   : > { %v3397_v28 = vadd.f32 %v1861_v29, %v1749_v61  ;;  %v1638_v31 = vpop.f32.mrf.mxu2  ;;  %v1528_v11 = vpop.f32.mrf.mxu1 }
 0x1d5   : > { %v1639_v9 = vadd.f32 %v1638_v31, %v1526_v62  ;;  %v1529_v2 = vadd.f32 %v1528_v11, %v1416_v42  ;;  %v709_v62 = vld [vmem:[#allocation2 + $0x90] sm:$0xff]  ;;  %v1419_v31 = vadd.f32 %v3229_v43, %v3154_v12 }
 0x1d6   : > { %2154 = vmatmul.f32.gmra.mxu3 %v771_v23  ;;  %v837_v23 = vld [vmem:[#allocation2 + $0x92] sm:$0xff] }
 0x1d7   : > { %1931 = vmatmul.f32.gmra.mxu1 %v834_v32  ;;  %v1867_v54 = vpop.f32.mrf.mxu0  ;;  %v773_v11 = vld [vmem:[#allocation2 + $0x91] sm:$0xff] }
 0x1d9   : > { %v1751_v60 = vpop.f32.mrf.mxu3  ;;  %2044 = vmatmul.f32.gmra.mxu2 %v708_v16 }
 0x1da   : > { %v1752_v3 = vadd.f32 %v1751_v60, %v1639_v9  ;;  %2270 = vmatmul.f32.gmra.mxu0 %v836_v14 }
 0x1dc   : > { %v3401_v30 = vadd.f32 %v1864_v48, %v1752_v3  ;;  %v1641_v29 = vpop.f32.mrf.mxu2  ;;  %v1531_v52 = vpop.f32.mrf.mxu1 }
 0x1dd   : > { %v1642_v61 = vadd.f32 %v1641_v29, %v1529_v2  ;;  %v1532_v9 = vadd.f32 %v1531_v52, %v1419_v31  ;;  %v710_v2 = vld [vmem:[#allocation2 + $0x98] sm:$0xff]  ;;  %v1422_v29 = vadd.f32 %v3229_v43, %v3165_v21 }
 0x1de   : > { %2157 = vmatmul.f32.gmra.mxu3 %v772_v37  ;;  %v838_v37 = vld [vmem:[#allocation2 + $0x9a] sm:$0xff] }
 0x1df   : > { %1934 = vmatmul.f32.gmra.mxu1 %v835_v6  ;;  %v1870_v32 = vpop.f32.mrf.mxu0  ;;  %v774_v52 = vld [vmem:[#allocation2 + $0x99] sm:$0xff] }
 0x1e1   : > { %v1754_v20 = vpop.f32.mrf.mxu3  ;;  %2047 = vmatmul.f32.gmra.mxu2 %v709_v62 }
 0x1e2   : > { %v1755_v16 = vadd.f32 %v1754_v20, %v1642_v61  ;;  %2273 = vmatmul.f32.gmra.mxu0 %v837_v23 }
 0x1e4   : > { %v3405_v42 = vadd.f32 %v1867_v54, %v1755_v16  ;;  %v1644_v48 = vpop.f32.mrf.mxu2  ;;  %v1534_v60 = vpop.f32.mrf.mxu1 }
 0x1e5   : > { %v1645_v3 = vadd.f32 %v1644_v48, %v1532_v9  ;;  %v1535_v61 = vadd.f32 %v1534_v60, %v1422_v29  ;;  %v711_v9 = vld [vmem:[#allocation2 + $0xa8] sm:$0xff]  ;;  %v1425_v48 = vadd.f32 %v3229_v43, %v3176_v34 }
 0x1e6   : > { %2160 = vmatmul.f32.gmra.mxu3 %v773_v11  ;;  %v839_v11 = vld [vmem:[#allocation2 + $0xaa] sm:$0xff] }
 0x1e7   : > { %1937 = vmatmul.f32.gmra.mxu1 %v836_v14  ;;  %v1873_v6 = vpop.f32.mrf.mxu0  ;;  %v775_v60 = vld [vmem:[#allocation2 + $0xa9] sm:$0xff] }
 0x1e9   : > { %v1757_v12 = vpop.f32.mrf.mxu3  ;;  %2050 = vmatmul.f32.gmra.mxu2 %v710_v2 }
 0x1ea   : > { %v1758_v62 = vadd.f32 %v1757_v12, %v1645_v3  ;;  %2276 = vmatmul.f32.gmra.mxu0 %v838_v37 }
 0x1ec   : > { %v3409_v31 = vadd.f32 %v1870_v32, %v1758_v62  ;;  %v1647_v54 = vpop.f32.mrf.mxu2  ;;  %v1537_v20 = vpop.f32.mrf.mxu1 }
 0x1ed   : > { %v1648_v16 = vadd.f32 %v1647_v54, %v1535_v61  ;;  %v1538_v3 = vadd.f32 %v1537_v20, %v1425_v48  ;;  %v712_v61 = vld [vmem:[#allocation2 + $0xb0] sm:$0xff]  ;;  %v1428_v54 = vadd.f32 %v3229_v43, %v3187_v38 }
 0x1ee   : > { %2163 = vmatmul.f32.gmra.mxu3 %v774_v52  ;;  %v840_v52 = vld [vmem:[#allocation2 + $0xb2] sm:$0xff] }
 0x1ef   : > { %1940 = vmatmul.f32.gmra.mxu1 %v837_v23  ;;  %v1876_v14 = vpop.f32.mrf.mxu0  ;;  %v776_v20 = vld [vmem:[#allocation2 + $0xb1] sm:$0xff] }
 0x1f1   : > { %v1760_v21 = vpop.f32.mrf.mxu3  ;;  %2053 = vmatmul.f32.gmra.mxu2 %v711_v9 }
 0x1f2   : > { %v1761_v2 = vadd.f32 %v1760_v21, %v1648_v16  ;;  %2279 = vmatmul.f32.gmra.mxu0 %v839_v11 }
 0x1f4   : > { %v3413_v29 = vadd.f32 %v1873_v6, %v1761_v2  ;;  %v1650_v32 = vpop.f32.mrf.mxu2  ;;  %v1540_v12 = vpop.f32.mrf.mxu1 }
 0x1f5   : > { %v1651_v62 = vadd.f32 %v1650_v32, %v1538_v3  ;;  %v1541_v16 = vadd.f32 %v1540_v12, %v1428_v54  ;;  %v713_v3 = vld [vmem:[#allocation2 + $0xc0] sm:$0xff]  ;;  %v1431_v32 = vadd.f32 %v3229_v43, %v3198_v51 }
 0x1f6   : > { %2166 = vmatmul.f32.gmra.mxu3 %v775_v60  ;;  %v841_v60 = vld [vmem:[#allocation2 + $0xc2] sm:$0xff] }
 0x1f7   : > { %1943 = vmatmul.f32.gmra.mxu1 %v838_v37  ;;  %v1879_v23 = vpop.f32.mrf.mxu0  ;;  %v777_v12 = vld [vmem:[#allocation2 + $0xc1] sm:$0xff] }
 0x1f9   : > { %v1763_v34 = vpop.f32.mrf.mxu3  ;;  %2056 = vmatmul.f32.gmra.mxu2 %v712_v61 }
 0x1fa   : > { %v1764_v9 = vadd.f32 %v1763_v34, %v1651_v62  ;;  %2282 = vmatmul.f32.gmra.mxu0 %v840_v52 }
 0x1fc   : > { %v3417_v48 = vadd.f32 %v1876_v14, %v1764_v9  ;;  %v1653_v6 = vpop.f32.mrf.mxu2  ;;  %v1543_v21 = vpop.f32.mrf.mxu1 }
 0x1fd   : > { %v1654_v2 = vadd.f32 %v1653_v6, %v1541_v16  ;;  %v1544_v62 = vadd.f32 %v1543_v21, %v1431_v32  ;;  %v714_v16 = vld [vmem:[#allocation2 + $0xc8] sm:$0xff]  ;;  %v1434_v6 = vadd.f32 %v3229_v43, %v3209_v47  ;;  %v2638_v47 = vld [vmem:[%s3557_s2] ss:$0 sm:$0xff] }
 0x1fe   : > { %2169 = vmatmul.f32.gmra.mxu3 %v776_v20  ;;  %v842_v20 = vld [vmem:[#allocation2 + $0xca] sm:$0xff]  ;;  %v1437_v43 = vadd.f32 %v2638_v47, %v3220_v17 }
 0x1ff   : > { %1946 = vmatmul.f32.gmra.mxu1 %v839_v11  ;;  %v1882_v37 = vpop.f32.mrf.mxu0  ;;  %v778_v21 = vld [vmem:[#allocation2 + $0xc9] sm:$0xff] }
 0x201   : > { %v1766_v38 = vpop.f32.mrf.mxu3  ;;  %2059 = vmatmul.f32.gmra.mxu2 %v713_v3 }
 0x202   : > { %v1767_v61 = vadd.f32 %v1766_v38, %v1654_v2  ;;  %2285 = vmatmul.f32.gmra.mxu0 %v841_v60 }
 0x204   : > { %v3421_v54 = vadd.f32 %v1879_v23, %v1767_v61  ;;  %v1656_v14 = vpop.f32.mrf.mxu2  ;;  %v1546_v34 = vpop.f32.mrf.mxu1 }
 0x205   : > { %v1657_v9 = vadd.f32 %v1656_v14, %v1544_v62  ;;  %v1547_v2 = vadd.f32 %v1546_v34, %v1434_v6  ;;  %v715_v62 = vld [vmem:[#allocation2 + $0xd8] sm:$0xff] }
 0x206   : > { %2172 = vmatmul.f32.gmra.mxu3 %v777_v12  ;;  %v843_v12 = vld [vmem:[#allocation2 + $0xda] sm:$0xff] }
 0x207   : > { %1949 = vmatmul.f32.gmra.mxu1 %v840_v52  ;;  %v1885_v11 = vpop.f32.mrf.mxu0 }
 0x209   : > { %v1769_v51 = vpop.f32.mrf.mxu3  ;;  %2062 = vmatmul.f32.gmra.mxu2 %v714_v16 }
 0x20a   : > { %v1770_v3 = vadd.f32 %v1769_v51, %v1657_v9  ;;  %2288 = vmatmul.f32.gmra.mxu0 %v842_v20  ;;  %v779_v9 = vld [vmem:[#allocation2 + $0xd9] sm:$0xff] }
 0x20c   : > { %v3425_v32 = vadd.f32 %v1882_v37, %v1770_v3  ;;  %v1659_v23 = vpop.f32.mrf.mxu2  ;;  %v1549_v38 = vpop.f32.mrf.mxu1 }
 0x20d   : > { %v1660_v61 = vadd.f32 %v1659_v23, %v1547_v2  ;;  %v1550_v37 = vadd.f32 %v1549_v38, %v1437_v43  ;;  %v1440_v23 = vadd.f32 %v2638_v47, %v3231_v27  ;;  %v781_v27 = vld [vmem:[#allocation2 + $0xf1] sm:$0xff] }
 0x20e   : > { %3566 = vst [vmem:[#allocation15_spill] sm:$0xff] %v3425_v32  ;;  %2175 = vmatmul.f32.gmra.mxu3 %v778_v21  ;;  %v844_v21 = vld [vmem:[#allocation2 + $0xe2] sm:$0xff] }
 0x20f   : > { %1952 = vmatmul.f32.gmra.mxu1 %v841_v60  ;;  %v1888_v52 = vpop.f32.mrf.mxu0  ;;  %v716_v60 = vld [vmem:[#allocation2 + $0xe0] sm:$0xff] }
 0x211   : > { %v1772_v14 = vpop.f32.mrf.mxu3  ;;  %2065 = vmatmul.f32.gmra.mxu2 %v715_v62  ;;  %v780_v62 = vld [vmem:[#allocation2 + $0xe1] sm:$0xff] }
 0x212   : > { %v1773_v34 = vadd.f32 %v1772_v14, %v1660_v61  ;;  %2291 = vmatmul.f32.gmra.mxu0 %v843_v12 }
 0x214   : > { %v3431_v16 = vadd.f32 %v1885_v11, %v1773_v34  ;;  %v1662_v6 = vpop.f32.mrf.mxu2  ;;  %v1552_v51 = vpop.f32.mrf.mxu1  ;;  %v717_v34 = vld [vmem:[#allocation2 + $0xf0] sm:$0xff] }
 0x215   : > { %v1663_v3 = vadd.f32 %v1662_v6, %v1550_v37  ;;  %v1553_v61 = vadd.f32 %v1552_v51, %v1440_v23 }
 0x216   : > { %2178 = vmatmul.f32.gmra.mxu3 %v779_v9 }
 0x217   : > { %1955 = vmatmul.f32.gmra.mxu1 %v842_v20  ;;  %v1891_v2 = vpop.f32.mrf.mxu0  ;;  %v845_v20 = vld [vmem:[#allocation2 + $0xf2] sm:$0xff] }
 0x219   : > { %v1775_v32 = vpop.f32.mrf.mxu3  ;;  %2068 = vmatmul.f32.gmra.mxu2 %v716_v60  ;;  %v718_v60 = vld [vmem:[#allocation2 + $0xf8] sm:$0xff] }
 0x21a   : > { %v1776_v17 = vadd.f32 %v1775_v32, %v1663_v3  ;;  %2294 = vmatmul.f32.gmra.mxu0 %v844_v21 }
 0x21c   : > { %v3434_v38 = vadd.f32 %v1888_v52, %v1776_v17  ;;  %v1665_v11 = vpop.f32.mrf.mxu2  ;;  %v1911_v43 = vpop.f32.mrf.mxu1  ;;  %v846_v17 = vld [vmem:[#allocation2 + $0xfa] sm:$0xff] }
 0x21d   : > { %v1666_v14 = vadd.f32 %v1665_v11, %v1553_v61  ;;  %v1912_v32 = vadd.f32 %v1911_v43, %v3241_v0 }
 0x21e   : > { %2181 = vmatmul.f32.gmra.mxu3 %v780_v62  ;;  %v782_v62 = vld [vmem:[#allocation2 + $0xf9] sm:$0xff] }
 0x21f   : > { %1958 = vmatmul.f32.gmra.mxu1 %v843_v12  ;;  %v2250_v37 = vpop.f32.mrf.mxu0 }
 0x221   : > { %v1778_v9 = vpop.f32.mrf.mxu3  ;;  %2071 = vmatmul.f32.gmra.mxu2 %v717_v34 }
 0x222   : > { %v1779_v6 = vadd.f32 %v1778_v9, %v1666_v14  ;;  %2297 = vmatmul.f32.gmra.mxu0 %v845_v20  ;;  %v719_v9 = vld [vmem:[#allocation2 + $0x108] sm:$0xff] }
 0x224   : > { %v3437_v47 = vadd.f32 %v1891_v2, %v1779_v6  ;;  %v2024_v51 = vpop.f32.mrf.mxu2  ;;  %v1914_v52 = vpop.f32.mrf.mxu1 }
 0x225   : > { %v2025_v3 = vadd.f32 %v2024_v51, %v1912_v32  ;;  %v1915_v11 = vadd.f32 %v1914_v52, %v3248_v7  ;;  %v783_v7 = vld [vmem:[#allocation2 + $0x109] sm:$0xff] }
 0x226   : > { %2184 = vmatmul.f32.gmra.mxu3 %v781_v27 }
 0x227   : > { %1961 = vmatmul.f32.gmra.mxu1 %v844_v21  ;;  %v2253_v23 = vpop.f32.mrf.mxu0  ;;  %v847_v21 = vld [vmem:[#allocation2 + $0x10a] sm:$0xff] }
 0x229   : > { %v2137_v12 = vpop.f32.mrf.mxu3  ;;  %2074 = vmatmul.f32.gmra.mxu2 %v718_v60 }
 0x22a   : > { %v2138_v61 = vadd.f32 %v2137_v12, %v2025_v3  ;;  %2300 = vmatmul.f32.gmra.mxu0 %v846_v17  ;;  %v720_v12 = vld [vmem:[#allocation2 + $0x110] sm:$0xff] }
 0x22c   : > { %v2251_v14 = vadd.f32 %v2250_v37, %v2138_v61  ;;  %v2027_v0 = vpop.f32.mrf.mxu2  ;;  %v1917_v2 = vpop.f32.mrf.mxu1 }
 0x22d   : > { %v2028_v34 = vadd.f32 %v2027_v0, %v1915_v11  ;;  %v1918_v37 = vadd.f32 %v1917_v2, %v3255_v10  ;;  %v784_v0 = vld [vmem:[#allocation2 + $0x111] sm:$0xff] }
 0x22e   : > { %v2346_v43 = vmax.f32 %v2251_v14, 0.0  ;;  %2187 = vmatmul.f32.gmra.mxu3 %v782_v62  ;;  %v848_v62 = vld [vmem:[#allocation2 + $0x112] sm:$0xff] }
 0x22f   : > { %1964 = vmatmul.f32.gmra.mxu1 %v845_v20  ;;  %v2256_v6 = vpop.f32.mrf.mxu0 }
 0x230   : > { %2378 = vst [vmem:[%s3442_s17] sm:$0xff] %v2346_v43 }
 0x231   : > { %v2140_v27 = vpop.f32.mrf.mxu3  ;;  %2077 = vmatmul.f32.gmra.mxu2 %v719_v9 }
 0x232   : > { %v2141_v32 = vadd.f32 %v2140_v27, %v2028_v34  ;;  %2303 = vmatmul.f32.gmra.mxu0 %v847_v21  ;;  %v721_v27 = vld [vmem:[#allocation2 + $0x120] sm:$0xff] }
 0x234   : > { %v2254_v51 = vadd.f32 %v2253_v23, %v2141_v32  ;;  %v2030_v52 = vpop.f32.mrf.mxu2  ;;  %v1920_v3 = vpop.f32.mrf.mxu1  ;;  %v849_v32 = vld [vmem:[#allocation2 + $0x122] sm:$0xff] }
 0x235   : > { %v2031_v20 = vadd.f32 %v2030_v52, %v1918_v37  ;;  %v1921_v43 = vadd.f32 %v1920_v3, %v3262_v5 }
 0x236   : > { %v2347_v60 = vmax.f32 %v2254_v51, 0.0  ;;  %2190 = vmatmul.f32.gmra.mxu3 %v783_v7 }
 0x237   : > { %1967 = vmatmul.f32.gmra.mxu1 %v846_v17  ;;  %v2259_v61 = vpop.f32.mrf.mxu0 }
 0x238   : > { %2379 = vst [vmem:[%s3442_s17 + $0x8] sm:$0xff] %v2347_v60  ;;  %v2639_v60 = vld [vmem:[#allocation2 + $0x121] sm:$0xff] }
 0x239   : > { %v2143_v11 = vpop.f32.mrf.mxu3  ;;  %2080 = vmatmul.f32.gmra.mxu2 %v720_v12  ;;  %v722_v12 = vld [vmem:[#allocation2 + $0x128] sm:$0xff] }
 0x23a   : > { %v2144_v14 = vadd.f32 %v2143_v11, %v2031_v20  ;;  %2306 = vmatmul.f32.gmra.mxu0 %v848_v62 }
 0x23c   : > { %v2257_v10 = vadd.f32 %v2256_v6, %v2144_v14  ;;  %v2033_v23 = vpop.f32.mrf.mxu2  ;;  %v1923_v2 = vpop.f32.mrf.mxu1 }
 0x23d   : > { %v2034_v9 = vadd.f32 %v2033_v23, %v1921_v43  ;;  %v1924_v51 = vadd.f32 %v1923_v2, %v3269_v57  ;;  %v2640_v23 = vld [vmem:[#allocation2 + $0x129] sm:$0xff] }
 0x23e   : > { %v2348_v34 = vmax.f32 %v2257_v10, 0.0  ;;  %2193 = vmatmul.f32.gmra.mxu3 %v784_v0 }
 0x23f   : > { %1970 = vmatmul.f32.gmra.mxu1 %v847_v21  ;;  %v2262_v17 = vpop.f32.mrf.mxu0 }
 0x240   : > { %2380 = vst [vmem:[%s3442_s17 + $0x10] sm:$0xff] %v2348_v34  ;;  %v723_v34 = vld [vmem:[#allocation2 + $0x138] sm:$0xff] }
 0x241   : > { %v2146_v7 = vpop.f32.mrf.mxu3  ;;  %2083 = vmatmul.f32.gmra.mxu2 %v721_v27 }
 0x242   : > { %v2147_v37 = vadd.f32 %v2146_v7, %v2034_v9  ;;  %2309 = vmatmul.f32.gmra.mxu0 %v849_v32 }
 0x244   : > { %v2260_v52 = vadd.f32 %v2259_v61, %v2147_v37  ;;  %v2036_v5 = vpop.f32.mrf.mxu2  ;;  %v1926_v6 = vpop.f32.mrf.mxu1  ;;  %v659_v37 = vld [vmem:[#allocation2 + $0x12a] sm:$0xff] }
 0x245   : > { %v2037_v20 = vadd.f32 %v2036_v5, %v1924_v51  ;;  %v1927_v0 = vadd.f32 %v1926_v6, %v3275_v35  ;;  %v724_v6 = vld [vmem:[#allocation2 + $0x140] sm:$0xff] }
 0x246   : > { %v2349_v3 = vmax.f32 %v2260_v52, 0.0  ;;  %2196 = vmatmul.f32.gmra.mxu3 %v2639_v60  ;;  %v2641_v52 = vld [vmem:[#allocation2 + $0x139] sm:$0xff] }
 0x247   : > { %1973 = vmatmul.f32.gmra.mxu1 %v848_v62  ;;  %v2265_v21 = vpop.f32.mrf.mxu0 }
 0x248   : > { %2381 = vst [vmem:[%s3442_s17 + $0x18] sm:$0xff] %v2349_v3 }
 0x249   : > { %v2149_v11 = vpop.f32.mrf.mxu3  ;;  %2086 = vmatmul.f32.gmra.mxu2 %v722_v12 }
 0x24a   : > { %v2150_v14 = vadd.f32 %v2149_v11, %v2037_v20  ;;  %2312 = vmatmul.f32.gmra.mxu0 %v3286_v44 }
 0x24c   : > { %v2263_v57 = vadd.f32 %v2262_v17, %v2150_v14  ;;  %v2039_v61 = vpop.f32.mrf.mxu2  ;;  %v1929_v43 = vpop.f32.mrf.mxu1 }
 0x24d   : > { %v2040_v2 = vadd.f32 %v2039_v61, %v1927_v0  ;;  %v1930_v44 = vadd.f32 %v1929_v43, %v3280_v41  ;;  %v725_v0 = vld [vmem:[#allocation2 + $0x150] sm:$0xff] }
 0x24e   : > { %v2350_v10 = vmax.f32 %v2263_v57, 0.0  ;;  %2199 = vmatmul.f32.gmra.mxu3 %v2640_v23 }
 0x24f   : > { %1976 = vmatmul.f32.gmra.mxu1 %v849_v32  ;;  %v2268_v62 = vpop.f32.mrf.mxu0 }
 0x250   : > { %2382 = vst [vmem:[%s3442_s17 + $0x20] sm:$0xff] %v2350_v10 }
 0x251   : > { %v2152_v9 = vpop.f32.mrf.mxu3  ;;  %2089 = vmatmul.f32.gmra.mxu2 %v723_v34 }
 0x252   : > { %v2153_v27 = vadd.f32 %v2152_v9, %v2040_v2  ;;  %2315 = vmatmul.f32.gmra.mxu0 %v3299_v19  ;;  %v661_v2 = vld [vmem:[#allocation2 + $0x142] sm:$0xff] }
 0x254   : > { %v2266_v35 = vadd.f32 %v2265_v21, %v2153_v27  ;;  %v2042_v17 = vpop.f32.mrf.mxu2  ;;  %v1932_v7 = vpop.f32.mrf.mxu1  ;;  %v660_v21 = vld [vmem:[#allocation2 + $0x13a] sm:$0xff] }
 0x255   : > { %v2043_v5 = vadd.f32 %v2042_v17, %v1930_v44  ;;  %v1933_v41 = vadd.f32 %v1932_v7, %v3284_v24  ;;  %v662_v7 = vld [vmem:[#allocation2 + $0x152] sm:$0xff] }
 0x256   : > { %v2351_v51 = vmax.f32 %v2266_v35, 0.0  ;;  %2202 = vmatmul.f32.gmra.mxu3 %v2641_v52 }
 0x257   : > { %1979 = vmatmul.f32.gmra.mxu1 %v659_v37  ;;  %v2271_v32 = vpop.f32.mrf.mxu0 }
 0x258   : > { %2383 = vst [vmem:[%s3442_s17 + $0x28] sm:$0xff] %v2351_v51  ;;  %v727_v51 = vld [vmem:[#allocation2 + $0x168] sm:$0xff] }
 0x259   : > { %v2155_v3 = vpop.f32.mrf.mxu3  ;;  %2092 = vmatmul.f32.gmra.mxu2 %v724_v6 }
 0x25a   : > { %v2156_v60 = vadd.f32 %v2155_v3, %v2043_v5  ;;  %2318 = vmatmul.f32.gmra.mxu0 %v3313_v22 }
 0x25c   : > { %v2269_v19 = vadd.f32 %v2268_v62, %v2156_v60  ;;  %v2045_v20 = vpop.f32.mrf.mxu2  ;;  %v1935_v12 = vpop.f32.mrf.mxu1  ;;  %v726_v62 = vld [vmem:[#allocation2 + $0x158] sm:$0xff] }
 0x25d   : > { %v2046_v14 = vadd.f32 %v2045_v20, %v1933_v41  ;;  %v1936_v24 = vadd.f32 %v1935_v12, %v3294_v13  ;;  %v663_v60 = vld [vmem:[#allocation2 + $0x15a] sm:$0xff] }
 0x25e   : > { %v2352_v11 = vmax.f32 %v2269_v19, 0.0  ;;  %2205 = vmatmul.f32.gmra.mxu3 %v3288_v59  ;;  %v728_v19 = vld [vmem:[#allocation2 + $0x170] sm:$0xff] }
 0x25f   : > { %1982 = vmatmul.f32.gmra.mxu1 %v660_v21  ;;  %v2274_v57 = vpop.f32.mrf.mxu0 }
 0x260   : > { %2384 = vst [vmem:[%s3442_s17 + $0x30] sm:$0xff] %v2352_v11 }
 0x261   : > { %v2158_v61 = vpop.f32.mrf.mxu3  ;;  %2095 = vmatmul.f32.gmra.mxu2 %v725_v0  ;;  %v664_v0 = vld [vmem:[#allocation2 + $0x16a] sm:$0xff] }
 0x262   : > { %v2159_v43 = vadd.f32 %v2158_v61, %v2046_v14  ;;  %2321 = vmatmul.f32.gmra.mxu0 %v3325_v49 }
 0x264   : > { %v2272_v22 = vadd.f32 %v2271_v32, %v2159_v43  ;;  %v2048_v10 = vpop.f32.mrf.mxu2  ;;  %v1938_v23 = vpop.f32.mrf.mxu1  ;;  %v857_v43 = vld [vmem:[#allocation2 + $0x182] sm:$0xff] }
 0x265   : > { %v2049_v59 = vadd.f32 %v2048_v10, %v1936_v24  ;;  %v1939_v13 = vadd.f32 %v1938_v23, %v3308_v26  ;;  %v793_v10 = vld [vmem:[#allocation2 + $0x181] sm:$0xff] }
 0x266   : > { %v2353_v34 = vmax.f32 %v2272_v22, 0.0  ;;  %2208 = vmatmul.f32.gmra.mxu3 %v3302_v36 }
 0x267   : > { %1985 = vmatmul.f32.gmra.mxu1 %v661_v2  ;;  %v2277_v9 = vpop.f32.mrf.mxu0 }
 0x268   : > { %2385 = vst [vmem:[%s3442_s17 + $0x38] sm:$0xff] %v2353_v34 }
 0x269   : > { %v2161_v27 = vpop.f32.mrf.mxu3  ;;  %2098 = vmatmul.f32.gmra.mxu2 %v726_v62 }
 0x26a   : > { %v2162_v44 = vadd.f32 %v2161_v27, %v2049_v59  ;;  %2324 = vmatmul.f32.gmra.mxu0 %v3336_v53 }
 0x26c   : > { %v2275_v49 = vadd.f32 %v2274_v57, %v2162_v44  ;;  %v2051_v35 = vpop.f32.mrf.mxu2  ;;  %v1941_v17 = vpop.f32.mrf.mxu1  ;;  %v3567_v44 = vld [vmem:[#allocation13_spill] sm:$0xff] }
 0x26d   : > { %v2052_v36 = vadd.f32 %v2051_v35, %v1939_v13  ;;  %v1942_v26 = vadd.f32 %v1941_v17, %v3323_v1 }
 0x26e   : > { %v2354_v37 = vmax.f32 %v2275_v49, 0.0  ;;  %2211 = vmatmul.f32.gmra.mxu3 %v3317_v58 }
 0x26f   : > { %1988 = vmatmul.f32.gmra.mxu1 %v662_v7  ;;  %v2280_v52 = vpop.f32.mrf.mxu0  ;;  %v2642_v7 = vld [vmem:[#allocation2 + $0x189] sm:$0xff] }
 0x270   : > { %2386 = vst [vmem:[%s3442_s17 + $0x40] sm:$0xff] %v2354_v37 }
 0x271   : > { %v2164_v5 = vpop.f32.mrf.mxu3  ;;  %2101 = vmatmul.f32.gmra.mxu2 %v727_v51  ;;  %v859_v51 = vld [vmem:[#allocation2 + $0x19a] sm:$0xff] }
 0x272   : > { %v2165_v6 = vadd.f32 %v2164_v5, %v2052_v36  ;;  %2327 = vmatmul.f32.gmra.mxu0 %v3347_v50  ;;  %v731_v36 = vld [vmem:[#allocation2 + $0x198] sm:$0xff] }
 0x273   : > { %v795_v5 = vld [vmem:[#allocation2 + $0x199] sm:$0xff] }
 0x274   : > { %v2278_v53 = vadd.f32 %v2277_v9, %v2165_v6  ;;  %v2054_v32 = vpop.f32.mrf.mxu2  ;;  %v1944_v3 = vpop.f32.mrf.mxu1  ;;  %v858_v9 = vld [vmem:[#allocation2 + $0x18a] sm:$0xff]  ;;  %v3568_v6 = vld [vmem:[#allocation14_spill] sm:$0xff] }
 0x275   : > { %v2055_v58 = vadd.f32 %v2054_v32, %v1942_v26  ;;  %v1945_v1 = vadd.f32 %v1944_v3, %v3334_v15 }
 0x276   : > { %v2355_v41 = vmax.f32 %v2278_v53, 0.0  ;;  %2214 = vmatmul.f32.gmra.mxu3 %v3328_v45 }
 0x277   : > { %1991 = vmatmul.f32.gmra.mxu1 %v663_v60  ;;  %v2283_v20 = vpop.f32.mrf.mxu0 }
 0x278   : > { %2387 = vst [vmem:[%s3442_s17 + $0x48] sm:$0xff] %v2355_v41 }
 0x279   : > { %v2167_v12 = vpop.f32.mrf.mxu3  ;;  %2104 = vmatmul.f32.gmra.mxu2 %v728_v19  ;;  %v860_v19 = vld [vmem:[#allocation2 + $0x1a2] sm:$0xff] }
 0x27a   : > { %v2168_v21 = vadd.f32 %v2167_v12, %v2055_v58  ;;  %2330 = vmatmul.f32.gmra.mxu0 %v3359_v39  ;;  %v2643_v12 = vld [vmem:[#allocation2 + $0x8] sm:$0xff] }
 0x27c   : > { %v2281_v50 = vadd.f32 %v2280_v52, %v2168_v21  ;;  %v2057_v11 = vpop.f32.mrf.mxu2  ;;  %v1947_v14 = vpop.f32.mrf.mxu1 }
 0x27d   : > { %v2058_v45 = vadd.f32 %v2057_v11, %v1945_v1  ;;  %v1948_v15 = vadd.f32 %v1947_v14, %v3345_v4  ;;  %v796_v1 = vld [vmem:[#allocation2 + $0x1a1] sm:$0xff] }
 0x27e   : > { %v2356_v57 = vmax.f32 %v2281_v50, 0.0  ;;  %2217 = vmatmul.f32.gmra.mxu3 %v3339_v46 }
 0x27f   : > { %1994 = vmatmul.f32.gmra.mxu1 %v664_v0  ;;  %v2286_v61 = vpop.f32.mrf.mxu0 }
 0x280   : > { %2388 = vst [vmem:[%s3442_s17 + $0x50] sm:$0xff] %v2356_v57 }
 0x281   : > { %v2170_v24 = vpop.f32.mrf.mxu3  ;;  %2107 = vmatmul.f32.gmra.mxu2 %v3354_v40 }
 0x282   : > { %v2171_v22 = vadd.f32 %v2170_v24, %v2058_v45  ;;  %2333 = vmatmul.f32.gmra.mxu0 %v857_v43 }
 0x284   : > { %v2284_v23 = vadd.f32 %v2283_v20, %v2171_v22  ;;  %v2060_v2 = vpop.f32.mrf.mxu2  ;;  %v1950_v34 = vpop.f32.mrf.mxu1 }
 0x285   : > { %v2061_v46 = vadd.f32 %v2060_v2, %v1948_v15  ;;  %v1951_v13 = vadd.f32 %v1950_v34, %v3567_v44 }
 0x286   : > { %v2357_v59 = vmax.f32 %v2284_v23, 0.0  ;;  %2220 = vmatmul.f32.gmra.mxu3 %v793_v10 }
 0x287   : > { %1997 = vmatmul.f32.gmra.mxu1 %v3359_v39  ;;  %v2289_v62 = vpop.f32.mrf.mxu0 }
 0x288   : > { %2389 = vst [vmem:[%s3442_s17 + $0x58] sm:$0xff] %v2357_v59 }
 0x289   : > { %v2173_v27 = vpop.f32.mrf.mxu3  ;;  %2110 = vmatmul.f32.gmra.mxu2 %v3366_v8 }
 0x28a   : > { %v2174_v40 = vadd.f32 %v2173_v27, %v2061_v46  ;;  %2336 = vmatmul.f32.gmra.mxu0 %v858_v9 }
 0x28c   : > { %v2287_v4 = vadd.f32 %v2286_v61, %v2174_v40  ;;  %v2063_v49 = vpop.f32.mrf.mxu2  ;;  %v1953_v35 = vpop.f32.mrf.mxu1 }
 0x28d   : > { %v2064_v37 = vadd.f32 %v2063_v49, %v1951_v13  ;;  %v1954_v26 = vadd.f32 %v1953_v35, %v3568_v6 }
 0x28e   : > { %v2358_v17 = vmax.f32 %v2287_v4, 0.0  ;;  %2223 = vmatmul.f32.gmra.mxu3 %v2642_v7 }
 0x28f   : > { %2000 = vmatmul.f32.gmra.mxu1 %v857_v43  ;;  %v2292_v39 = vpop.f32.mrf.mxu0 }
 0x290   : > { %2390 = vst [vmem:[%s3442_s17 + $0x60] sm:$0xff] %v2358_v17 }
 0x291   : > { %v2176_v52 = vpop.f32.mrf.mxu3  ;;  %2113 = vmatmul.f32.gmra.mxu2 %v731_v36 }
 0x292   : > { %v2177_v8 = vadd.f32 %v2176_v52, %v2064_v37  ;;  %2339 = vmatmul.f32.gmra.mxu0 %v859_v51 }
 0x294   : > { %v2290_v53 = vadd.f32 %v2289_v62, %v2177_v8  ;;  %v2066_v32 = vpop.f32.mrf.mxu2  ;;  %v1956_v3 = vpop.f32.mrf.mxu1 }
 0x295   : > { %v2067_v41 = vadd.f32 %v2066_v32, %v1954_v26  ;;  %v1957_v50 = vadd.f32 %v1956_v3, %v3373_v63 }
 0x296   : > { %v2359_v60 = vmax.f32 %v2290_v53, 0.0  ;;  %2226 = vmatmul.f32.gmra.mxu3 %v795_v5 }
 0x297   : > { %2003 = vmatmul.f32.gmra.mxu1 %v858_v9  ;;  %v2295_v58 = vpop.f32.mrf.mxu0 }
 0x298   : > { %2391 = vst [vmem:[%s3442_s17 + $0x68] sm:$0xff] %v2359_v60 }
 0x299   : > { %v2179_v20 = vpop.f32.mrf.mxu3  ;;  %2116 = vmatmul.f32.gmra.mxu2 %v2643_v12 }
 0x29a   : > { %v2180_v21 = vadd.f32 %v2179_v20, %v2067_v41  ;;  %2342 = vmatmul.f32.gmra.mxu0 %v860_v19 }
 0x29c   : > { %v2293_v11 = vadd.f32 %v2292_v39, %v2180_v21  ;;  %v2069_v14 = vpop.f32.mrf.mxu2  ;;  %v1959_v0 = vpop.f32.mrf.mxu1 }
 0x29d   : > { %v2070_v45 = vadd.f32 %v2069_v14, %v1957_v50  ;;  %v1960_v22 = vadd.f32 %v1959_v0, %v3377_v55 }
 0x29e   : > { %v2360_v57 = vmax.f32 %v2293_v11, 0.0  ;;  %2229 = vmatmul.f32.gmra.mxu3 %v796_v1 }
 0x29f   : > { %v2298_v61 = vpop.f32.mrf.mxu0 }
 0x2a0   : > { %2392 = vst [vmem:[%s3442_s17 + $0x70] sm:$0xff] %v2360_v57 }
 0x2a1   : > { %v2182_v43 = vpop.f32.mrf.mxu3 }
 0x2a2   : > { %v2183_v24 = vadd.f32 %v2182_v43, %v2070_v45 }
 0x2a4   : > { %v2296_v10 = vadd.f32 %v2295_v58, %v2183_v24  ;;  %v2072_v15 = vpop.f32.mrf.mxu2  ;;  %v1962_v23 = vpop.f32.mrf.mxu1 }
 0x2a5   : > { %v2073_v34 = vadd.f32 %v2072_v15, %v1960_v22  ;;  %v1963_v62 = vadd.f32 %v1962_v23, %v3381_v33 }
 0x2a6   : > { %v2361_v2 = vmax.f32 %v2296_v10, 0.0 }
 0x2a7   : > { %v2301_v63 = vpop.f32.mrf.mxu0 }
 0x2a8   : > { %2393 = vst [vmem:[%s3442_s17 + $0x78] sm:$0xff] %v2361_v2 }
 0x2a9   : > { %v2185_v59 = vpop.f32.mrf.mxu3 }
 0x2aa   : > { %v2186_v46 = vadd.f32 %v2185_v59, %v2073_v34 }
 0x2ac   : > { %v2299_v9 = vadd.f32 %v2298_v61, %v2186_v46  ;;  %v2075_v27 = vpop.f32.mrf.mxu2  ;;  %v1965_v40 = vpop.f32.mrf.mxu1 }
 0x2ad   : > { %v2076_v13 = vadd.f32 %v2075_v27, %v1963_v62  ;;  %v1966_v35 = vadd.f32 %v1965_v40, %v3385_v25 }
 0x2ae   : > { %v2362_v44 = vmax.f32 %v2299_v9, 0.0 }
 0x2af   : > { %v2304_v4 = vpop.f32.mrf.mxu0 }
 0x2b0   : > { %2394 = vst [vmem:[%s3442_s17 + $0x80] sm:$0xff] %v2362_v44 }
 0x2b1   : > { %v2188_v55 = vpop.f32.mrf.mxu3 }
 0x2b2   : > { %v2189_v49 = vadd.f32 %v2188_v55, %v2076_v13 }
 0x2b4   : > { %v2302_v17 = vadd.f32 %v2301_v63, %v2189_v49  ;;  %v2078_v7 = vpop.f32.mrf.mxu2  ;;  %v1968_v37 = vpop.f32.mrf.mxu1 }
 0x2b5   : > { %v2079_v39 = vadd.f32 %v2078_v7, %v1966_v35  ;;  %v1969_v8 = vadd.f32 %v1968_v37, %v3389_v18 }
 0x2b6   : > { %v2363_v36 = vmax.f32 %v2302_v17, 0.0 }
 0x2b7   : > { %v2307_v51 = vpop.f32.mrf.mxu0 }
 0x2b8   : > { %2395 = vst [vmem:[%s3442_s17 + $0x88] sm:$0xff] %v2363_v36 }
 0x2b9   : > { %v2191_v33 = vpop.f32.mrf.mxu3 }
 0x2ba   : > { %v2192_v52 = vadd.f32 %v2191_v33, %v2079_v39 }
 0x2bc   : > { %v2305_v5 = vadd.f32 %v2304_v4, %v2192_v52  ;;  %v2081_v6 = vpop.f32.mrf.mxu2  ;;  %v1971_v26 = vpop.f32.mrf.mxu1 }
 0x2bd   : > { %v2082_v32 = vadd.f32 %v2081_v6, %v1969_v8  ;;  %v1972_v41 = vadd.f32 %v1971_v26, %v3393_v56 }
 0x2be   : > { %v2364_v53 = vmax.f32 %v2305_v5, 0.0 }
 0x2bf   : > { %v2310_v3 = vpop.f32.mrf.mxu0 }
 0x2c0   : > { %2396 = vst [vmem:[%s3442_s17 + $0x90] sm:$0xff] %v2364_v53 }
 0x2c1   : > { %v2194_v25 = vpop.f32.mrf.mxu3 }
 0x2c2   : > { %v2195_v60 = vadd.f32 %v2194_v25, %v2082_v32 }
 0x2c4   : > { %v2308_v58 = vadd.f32 %v2307_v51, %v2195_v60  ;;  %v2084_v19 = vpop.f32.mrf.mxu2  ;;  %v1974_v20 = vpop.f32.mrf.mxu1 }
 0x2c5   : > { %v2085_v21 = vadd.f32 %v2084_v19, %v1972_v41  ;;  %v1975_v11 = vadd.f32 %v1974_v20, %v3397_v28 }
 0x2c6   : > { %v2365_v12 = vmax.f32 %v2308_v58, 0.0 }
 0x2c7   : > { %v2313_v1 = vpop.f32.mrf.mxu0 }
 0x2c8   : > { %2397 = vst [vmem:[%s3442_s17 + $0x98] sm:$0xff] %v2365_v12 }
 0x2c9   : > { %v2197_v18 = vpop.f32.mrf.mxu3 }
 0x2ca   : > { %v2198_v50 = vadd.f32 %v2197_v18, %v2085_v21 }
 0x2cc   : > { %v2311_v14 = vadd.f32 %v2310_v3, %v2198_v50  ;;  %v2087_v0 = vpop.f32.mrf.mxu2  ;;  %v1977_v57 = vpop.f32.mrf.mxu1 }
 0x2cd   : > { %v2088_v61 = vadd.f32 %v2087_v0, %v1975_v11  ;;  %v1978_v22 = vadd.f32 %v1977_v57, %v3401_v30  ;;  %v3569_v57 = vld [vmem:[#allocation15_spill] sm:$0xff] }
 0x2ce   : > { %v2366_v45 = vmax.f32 %v2311_v14, 0.0 }
 0x2cf   : > { %v2316_v43 = vpop.f32.mrf.mxu0 }
 0x2d0   : > { %2398 = vst [vmem:[%s3442_s17 + $0xa0] sm:$0xff] %v2366_v45 }
 0x2d1   : > { %v2200_v56 = vpop.f32.mrf.mxu3 }
 0x2d2   : > { %v2201_v24 = vadd.f32 %v2200_v56, %v2088_v61 }
 0x2d4   : > { %v2314_v10 = vadd.f32 %v2313_v1, %v2201_v24  ;;  %v2090_v15 = vpop.f32.mrf.mxu2  ;;  %v1980_v23 = vpop.f32.mrf.mxu1 }
 0x2d5   : > { %v2091_v34 = vadd.f32 %v2090_v15, %v1978_v22  ;;  %v1981_v46 = vadd.f32 %v1980_v23, %v3405_v42 }
 0x2d6   : > { %v2367_v2 = vmax.f32 %v2314_v10, 0.0 }
 0x2d7   : > { %v2319_v63 = vpop.f32.mrf.mxu0 }
 0x2d8   : > { %2399 = vst [vmem:[%s3442_s17 + $0xa8] sm:$0xff] %v2367_v2 }
 0x2d9   : > { %v2203_v28 = vpop.f32.mrf.mxu3 }
 0x2da   : > { %v2204_v59 = vadd.f32 %v2203_v28, %v2091_v34 }
 0x2dc   : > { %v2317_v62 = vadd.f32 %v2316_v43, %v2204_v59  ;;  %v2093_v9 = vpop.f32.mrf.mxu2  ;;  %v1983_v27 = vpop.f32.mrf.mxu1 }
 0x2dd   : > { %v2094_v44 = vadd.f32 %v2093_v9, %v1981_v46  ;;  %v1984_v55 = vadd.f32 %v1983_v27, %v3409_v31 }
 0x2de   : > { %v2368_v40 = vmax.f32 %v2317_v62, 0.0 }
 0x2df   : > { %v2322_v13 = vpop.f32.mrf.mxu0 }
 0x2e0   : > { %2400 = vst [vmem:[%s3442_s17 + $0xb0] sm:$0xff] %v2368_v40 }
 0x2e1   : > { %v2206_v30 = vpop.f32.mrf.mxu3 }
 0x2e2   : > { %v2207_v4 = vadd.f32 %v2206_v30, %v2094_v44 }
 0x2e4   : > { %v2320_v49 = vadd.f32 %v2319_v63, %v2207_v4  ;;  %v2096_v35 = vpop.f32.mrf.mxu2  ;;  %v1986_v17 = vpop.f32.mrf.mxu1 }
 0x2e5   : > { %v2097_v37 = vadd.f32 %v2096_v35, %v1984_v55  ;;  %v1987_v51 = vadd.f32 %v1986_v17, %v3413_v29 }
 0x2e6   : > { %v2369_v7 = vmax.f32 %v2320_v49, 0.0 }
 0x2e7   : > { %v2325_v36 = vpop.f32.mrf.mxu0 }
 0x2e8   : > { %2401 = vst [vmem:[%s3442_s17 + $0xb8] sm:$0xff] %v2369_v7 }
 0x2e9   : > { %v2209_v42 = vpop.f32.mrf.mxu3 }
 0x2ea   : > { %v2210_v39 = vadd.f32 %v2209_v42, %v2097_v37 }
 0x2ec   : > { %v2323_v33 = vadd.f32 %v2322_v13, %v2210_v39  ;;  %v2099_v52 = vpop.f32.mrf.mxu2  ;;  %v1989_v8 = vpop.f32.mrf.mxu1 }
 0x2ed   : > { %v2100_v6 = vadd.f32 %v2099_v52, %v1987_v51  ;;  %v1990_v32 = vadd.f32 %v1989_v8, %v3417_v48 }
 0x2ee   : > { %v2370_v5 = vmax.f32 %v2323_v33, 0.0 }
 0x2ef   : > { %v2328_v26 = vpop.f32.mrf.mxu0 }
 0x2f0   : > { %2402 = vst [vmem:[%s3442_s17 + $0xc0] sm:$0xff] %v2370_v5 }
 0x2f1   : > { %v2212_v31 = vpop.f32.mrf.mxu3 }
 0x2f2   : > { %v2213_v53 = vadd.f32 %v2212_v31, %v2100_v6 }
 0x2f4   : > { %v2326_v3 = vadd.f32 %v2325_v36, %v2213_v53  ;;  %v2102_v25 = vpop.f32.mrf.mxu2  ;;  %v1992_v60 = vpop.f32.mrf.mxu1 }
 0x2f5   : > { %v2103_v58 = vadd.f32 %v2102_v25, %v1990_v32  ;;  %v1993_v12 = vadd.f32 %v1992_v60, %v3421_v54 }
 0x2f6   : > { %v2371_v41 = vmax.f32 %v2326_v3, 0.0 }
 0x2f7   : > { %v2331_v19 = vpop.f32.mrf.mxu0 }
 0x2f8   : > { %2403 = vst [vmem:[%s3442_s17 + $0xc8] sm:$0xff] %v2371_v41 }
 0x2f9   : > { %v2215_v29 = vpop.f32.mrf.mxu3 }
 0x2fa   : > { %v2216_v20 = vadd.f32 %v2215_v29, %v2103_v58 }
 0x2fc   : > { %v2329_v21 = vadd.f32 %v2328_v26, %v2216_v20  ;;  %v2105_v1 = vpop.f32.mrf.mxu2  ;;  %v1995_v18 = vpop.f32.mrf.mxu1 }
 0x2fd   : > { %v2106_v11 = vadd.f32 %v2105_v1, %v1993_v12  ;;  %v1996_v45 = vadd.f32 %v1995_v18, %v3569_v57 }
 0x2fe   : > { %v2372_v50 = vmax.f32 %v2329_v21, 0.0 }
 0x2ff   : > { %v2334_v0 = vpop.f32.mrf.mxu0 }
 0x300   : > { %2404 = vst [vmem:[%s3442_s17 + $0xd0] sm:$0xff] %v2372_v50 }
 0x301   : > { %v2218_v48 = vpop.f32.mrf.mxu3 }
 0x302   : > { %v2219_v14 = vadd.f32 %v2218_v48, %v2106_v11 }
 0x304   : > { %v2332_v61 = vadd.f32 %v2331_v19, %v2219_v14  ;;  %v2108_v43 = vpop.f32.mrf.mxu2  ;;  %v1998_v56 = vpop.f32.mrf.mxu1 }
 0x305   : > { %v2109_v22 = vadd.f32 %v2108_v43, %v1996_v45  ;;  %v1999_v15 = vadd.f32 %v1998_v56, %v3431_v16 }
 0x306   : > { %v2373_v24 = vmax.f32 %v2332_v61, 0.0 }
 0x307   : > { %v2337_v34 = vpop.f32.mrf.mxu0 }
 0x308   : > { %2405 = vst [vmem:[%s3442_s17 + $0xd8] sm:$0xff] %v2373_v24 }
 0x309   : > { %v2221_v54 = vpop.f32.mrf.mxu3 }
 0x30a   : > { %v2222_v10 = vadd.f32 %v2221_v54, %v2109_v22 }
 0x30c   : > { %v2335_v23 = vadd.f32 %v2334_v0, %v2222_v10  ;;  %v2111_v2 = vpop.f32.mrf.mxu2  ;;  %v2001_v59 = vpop.f32.mrf.mxu1 }
 0x30d   : > { %v2112_v28 = vadd.f32 %v2111_v2, %v1999_v15  ;;  %v2002_v9 = vadd.f32 %v2001_v59, %v3434_v38 }
 0x30e   : > { %v2374_v63 = vmax.f32 %v2335_v23, 0.0 }
 0x30f   : > { %v2340_v30 = vpop.f32.mrf.mxu0 }
 0x310   : > { %2406 = vst [vmem:[%s3442_s17 + $0xe0] sm:$0xff] %v2374_v63 }
 0x311   : > { %v2224_v46 = vpop.f32.mrf.mxu3 }
 0x312   : > { %v2225_v62 = vadd.f32 %v2224_v46, %v2112_v28 }
 0x314   : > { %v2338_v27 = vadd.f32 %v2337_v34, %v2225_v62  ;;  %v2114_v40 = vpop.f32.mrf.mxu2  ;;  %v2004_v16 = vpop.f32.mrf.mxu1 }
 0x315   : > { %v2115_v13 = vadd.f32 %v2114_v40, %v2002_v9  ;;  %v2005_v49 = vadd.f32 %v2004_v16, %v3437_v47 }
 0x316   : > { %v2375_v44 = vmax.f32 %v2338_v27, 0.0 }
 0x317   : > { %v2343_v36 = vpop.f32.mrf.mxu0 }
 0x318   : > { %2407 = vst [vmem:[%s3442_s17 + $0xe8] sm:$0xff] %v2375_v44 }
 0x319   : > { %v2227_v4 = vpop.f32.mrf.mxu3 }
 0x31a   : > { %v2228_v55 = vadd.f32 %v2227_v4, %v2115_v13 }
 0x31c   : > { %v2341_v35 = vadd.f32 %v2340_v30, %v2228_v55  ;;  %v2117_v17 = vpop.f32.mrf.mxu2 }
 0x31d   : > { %v2118_v38 = vadd.f32 %v2117_v17, %v2005_v49 }
 0x31e   : > { %v2376_v7 = vmax.f32 %v2341_v35, 0.0 }
 0x320   : > { %2408 = vst [vmem:[%s3442_s17 + $0xf0] sm:$0xff] %v2376_v7 }
 0x321   : > { %v2230_v37 = vpop.f32.mrf.mxu3 }
 0x322   : > { %v2231_v42 = vadd.f32 %v2230_v37, %v2118_v38 }
 0x324   : > { %v2344_v39 = vadd.f32 %v2343_v36, %v2231_v42 }
 0x326   : > { %v2377_v47 = vmax.f32 %v2344_v39, 0.0 }
 0x328   : > { %2409 = vst [vmem:[%s3442_s17 + $0xf8] sm:$0xff] %v2377_v47 }
 0x329   : > { %2731 = shalt.err (!%p2728_p10)
}
 0x32a   : > { %s2780_s6 = smov 128   ;;  %s2781_s23 = smov 8  }
 0x32b   : > { %2581 = dma.vmem_to_hbm [thread:$0]  (%p2871_p3), %s2424_s30, 4096, %s2426_s7, %s2411_s8, %s2780_s6, %s2780_s6, %s2781_s23  }
 0x32c PF: > { %s2440_s27 = sand.u32 1, %s2762_s12   ;;  %p3570_p12 = scmp.ge.s32.totalorder %s2774_s15, 2 }
 0x32d   : > { %s2441_s28 = scalar_lea.sflag [#allocation6], %s2440_s27 }
 0x32e   : > { %p2592_p13 = pnand %p3570_p12, %p2837_p6 }
 0x330   : > { %p2593_p0 = pneg %p2592_p13 }
 0x332   : > { %2757 = dma.done.wait (%p2593_p0), %s2441_s28, 4096  }
 0x333   : > { %2759 = vsyncadd (%p2593_p0), %s2441_s28, 4294963200  ;;  %p17_p5 = scmp.ge.s32.totalorder %s2855_s26, 4   ;;  %s3571_s12 = smov %s2766_s13 }
 0x334   : > { %s3572_s13 = smov %s2770_s14  ;;  %s3573_s14 = smov %s2867_s4 }
 0x335   : > { %s3574_s15 = smov %s2855_s26  ;;  %19 = sbr.rel (!%p17_p5) target bundleno = 6 (0x6), region = 84 }
 0x33a   :  { %2447 = vsyncpa [#allocation5], 1 }
 0x33b   :  { %2449 = vsyncpa [#allocation5 + $0x1], 1 }
 0x33c   :  { %2450 = vsyncpa [#allocation8], 1 }
 0x33d   :  { %2451 = vsyncpa [#allocation6], 1 }
 0x33e   :  { %2453 = vsyncpa [#allocation6 + $0x1], 1 }

</bundles_post_ra>
